<compile_context>
chip_gen: v5e
topology: v5e:2x2
jax: 0.10.0
libtpu: 0.0.40
codegen_flags: <defaults>
</compile_context>

<pallas_src>
import math

import jax
import jax.numpy as jnp
from jax.experimental import pallas as pl
from jax.experimental.pallas import tpu as pltpu


# ----------------------------- config ---------------------------------------
class Config:
    steps_per_epoch = 10
    offset_bits = 6            # offset_size = 64
    pc_embed_size = 16
    page_embed_size = 32
    num_experts = 1
    lstm_size = 32             # must equal page_embed_size
    lstm_layers = 1
    sequence_length = 8
    batch_size = 2
    sequence_loss = False
    lstm_dropout = 0.0
    contrastive_hidden_dim = 32
    contrastive_size = 32
    use_contrastive = False
    pc_localized = False
    global_stream = False


PC_VOCAB = 64
PAGE_VOCAB = 128


# ----------------------------- static layout ---------------------------------
def derive_dims(cfg):
    """Static sizes + weight-slab row offsets (Python ints, jit-safe closures)."""
    H = cfg.lstm_size
    E = cfg.page_embed_size
    PCE = cfg.pc_embed_size
    offset_size = 1 << cfg.offset_bits
    d = dict(
        H=H, E=E, PCE=PCE, G=2 * H, GW=8 * H,
        EMB_W=2 * E + PCE,                                    # 80
        VOCAB=PAGE_VOCAB + offset_size + PC_VOCAB,            # 256
        QKV_W=3 * E,                                          # 96
        Vp=PAGE_VOCAB, Vo=offset_size,
        HEAD_W=-(-(PAGE_VOCAB + offset_size) // 128) * 128,   # 256 (lane dense)
    )
    d['SLAB_W'] = max(d['GW'], d['HEAD_W'], d['QKV_W'], d['EMB_W'])
    row_sizes = [d['VOCAB'], 2 * E, E, d['EMB_W'], E, d['G'], d['G']]
    names = ['r_tab', 'r_qkv', 'r_wo', 'r_wih_emb', 'r_wih_attn', 'r_whh', 'r_whead']
    r = 0
    for name, sz in zip(names, row_sizes):
        d[name] = r
        r += sz
    d['SLAB_ROWS'] = r
    return d


# ----------------------------- fused Pallas kernel ---------------------------
def build_kernel(dims, L, B_pad):
    """Whole Voyager forward (embeddings + MHA + both LSTMs + head) in one kernel.

    Row layout is time-major flat: row r = l*B_pad + b, N = L*B_pad rows.
      idx_ref:  (N, 4) int32 — fused-vocab ids [page, off+128, pc+192, pad]
      w_ref:    (SLAB_ROWS, SLAB_W) bf16 — packed weight slab (see fuse_params)
      bias_ref: (2, SLAB_W) f32 — row 0 gate bias (b_ih+b_hh), row 1 head bias
      out_ref:  (B_pad, HEAD_W) f32 — [page logits | offset logits | zero pad]
    """
    E, PCE, G, GW = dims['E'], dims['PCE'], dims['G'], dims['GW']
    EMB_W, VOCAB = dims['EMB_W'], dims['VOCAB']
    QKV_W, HEAD_W = dims['QKV_W'], dims['HEAD_W']
    r_tab, r_qkv, r_wo = dims['r_tab'], dims['r_qkv'], dims['r_wo']
    r_wie, r_wia = dims['r_wih_emb'], dims['r_wih_attn']
    r_whh, r_whd = dims['r_whh'], dims['r_whead']
    N = L * B_pad
    inv_sqrt_e = 1.0 / math.sqrt(E)
    assert B_pad & (B_pad - 1) == 0, "B_pad must be a power of two"

    def kernel(idx_ref, w_ref, bias_ref, out_ref):
        f32, bf16 = jnp.float32, jnp.bfloat16

        # ---- fused one-hot embedding gather: embs = [page_e | off_e | pc_e] ----
        idx = idx_ref[...]                                            # (N, 4)
        iota = jax.lax.broadcasted_iota(jnp.int32, (N, VOCAB), 1)
        onehot = ((iota == idx[:, 0:1]) | (iota == idx[:, 1:2])
                  | (iota == idx[:, 2:3])).astype(bf16)               # exact in bf16
        embs = jnp.dot(onehot, w_ref[r_tab:r_tab + VOCAB, 0:EMB_W],
                       preferred_element_type=f32)                    # (N, 80)

        # ---- fused block-diagonal q/kv projection (biases are zero) ----
        qkv = jnp.dot(embs[:, 0:2 * E].astype(bf16),
                      w_ref[r_qkv:r_qkv + 2 * E, 0:QKV_W],
                      preferred_element_type=f32)                     # (N, 96)
        q, k, v = qkv[:, 0:E], qkv[:, E:2 * E], qkv[:, 2 * E:3 * E]

        # ---- single-head MHA with in-kernel same-batch (block-diag) mask ----
        s = jax.lax.dot_general(q.astype(bf16), k.astype(bf16),
                                (((1,), (1,)), ((), ())),
                                preferred_element_type=f32)           # (N, N)
        rb = jax.lax.broadcasted_iota(jnp.int32, (N, N), 0) & (B_pad - 1)
        cb = jax.lax.broadcasted_iota(jnp.int32, (N, N), 1) & (B_pad - 1)
        s = s * inv_sqrt_e + jnp.where(rb == cb, 0.0, -1e30)          # f32
        s = s - jnp.max(s, axis=-1, keepdims=True)
        p = jnp.exp(s)
        p = p * pl.reciprocal(jnp.sum(p, axis=-1, keepdims=True), approx=True)
        ctx = jnp.dot(p.astype(bf16), v.astype(bf16),
                      preferred_element_type=f32)                     # (N, E)
        attn = jnp.dot(ctx.astype(bf16), w_ref[r_wo:r_wo + E, 0:E],
                       preferred_element_type=f32)                    # (N, E)

        # ---- LSTM input projection hoisted out of the recurrence ----
        # (no lane-concat: wih_emb rows follow the embs column order, offset
        #  rows zeroed since attn replaces offset_embed as the LSTM input)
        xproj = (jnp.dot(embs.astype(bf16), w_ref[r_wie:r_wie + EMB_W, 0:GW],
                         preferred_element_type=f32)
                 + jnp.dot(attn.astype(bf16), w_ref[r_wia:r_wia + E, 0:GW],
                           preferred_element_type=f32)
                 + bias_ref[0:1, 0:GW])                               # (N, 8H)

        # ---- fused coarse+fine LSTM; gate cols [i|f|o|g], each [coarse|fine] ----
        whh = w_ref[r_whh:r_whh + G, 0:GW]                            # (2H, 8H)
        h = jnp.zeros((B_pad, G), f32)                                # [h_c | h_f]
        c = jnp.zeros((B_pad, G), f32)
        for t in range(L):                                            # serial path
            gates = (xproj[t * B_pad:(t + 1) * B_pad, :]
                     + jnp.dot(h.astype(bf16), whh, preferred_element_type=f32))
            sig = jax.nn.sigmoid(gates[:, 0:3 * G])                   # i, f, o only
            g_g = jnp.tanh(gates[:, 3 * G:4 * G])                     # g only
            c = sig[:, G:2 * G] * c + sig[:, 0:G] * g_g
            h = sig[:, 2 * G:3 * G] * jnp.tanh(c)

        # ---- output head: block-diag [page_linear | offset_linear], lane-dense ----
        out_ref[...] = (jnp.dot(h.astype(bf16),
                                w_ref[r_whd:r_whd + G, 0:HEAD_W],
                                preferred_element_type=f32)
                        + bias_ref[1:2, 0:HEAD_W])                    # (B_pad, 256)

    return kernel


# ----------------------------- parameter init --------------------------------
def xavier_uniform(key, shape):
    fan_out, fan_in = shape[0], shape[1]
    a = math.sqrt(6.0 / (fan_in + fan_out))
    return jax.random.uniform(key, shape, jnp.float32, -a, a)


def uniform_pm(key, shape, bound):
    return jax.random.uniform(key, shape, jnp.float32, -bound, bound)


def init_params(cfg, key):
    E = cfg.page_embed_size          # == lstm_size
    H = cfg.lstm_size
    offset_size = 1 << cfg.offset_bits
    d_in = cfg.pc_embed_size + cfg.page_embed_size + cfg.page_embed_size * cfg.num_experts
    ks = jax.random.split(key, 20)
    bnd = 1.0 / math.sqrt(H)
    return {
        'pc_embedding': xavier_uniform(ks[0], (PC_VOCAB, cfg.pc_embed_size)),
        'page_embedding': xavier_uniform(ks[1], (PAGE_VOCAB, cfg.lstm_size)),
        'offset_embedding': xavier_uniform(ks[2], (offset_size, cfg.lstm_size)),
        'wq': xavier_uniform(ks[3], (E, E)),
        'wk': xavier_uniform(ks[4], (E, E)),
        'wv': xavier_uniform(ks[5], (E, E)),
        'wo': xavier_uniform(ks[6], (E, E)),
        'coarse_w_ih': uniform_pm(ks[7], (4 * H, d_in), bnd),
        'coarse_w_hh': uniform_pm(ks[8], (4 * H, H), bnd),
        'coarse_b_ih': uniform_pm(ks[9], (4 * H,), bnd),
        'coarse_b_hh': uniform_pm(ks[10], (4 * H,), bnd),
        'fine_w_ih': uniform_pm(ks[11], (4 * H, d_in), bnd),
        'fine_w_hh': uniform_pm(ks[12], (4 * H, H), bnd),
        'fine_b_ih': uniform_pm(ks[13], (4 * H,), bnd),
        'fine_b_hh': uniform_pm(ks[14], (4 * H,), bnd),
        'page_w': xavier_uniform(ks[15], (PAGE_VOCAB, H)),
        'page_b': uniform_pm(ks[16], (PAGE_VOCAB,), bnd),
        'off_w': xavier_uniform(ks[17], (offset_size, H)),
        'off_b': uniform_pm(ks[18], (offset_size,), bnd),
    }


# ----------------------------- weight fusion (once, outside forward) ----------
def fuse_params(params, cfg):
    """Pack every kernel weight into one bf16 slab + one small f32 bias slab.

    Gate column order (lane dim) is [i | f | o | g], each G=2H wide, each gate
    block laid out [coarse H | fine H] to match h = [h_coarse | h_fine].
    """
    d = derive_dims(cfg)
    H, E, PCE, G, GW = d['H'], d['E'], d['PCE'], d['G'], d['GW']
    Vp, Vo = d['Vp'], d['Vo']
    offset_size = Vo
    GATE_ORDER = (0, 1, 3, 2)        # torch gate order [i,f,g,o] -> kernel [i,f,o,g]

    # --- fused embedding table: rows [page; off; pc], cols [page_e|off_e|pc_e] ---
    table = jnp.zeros((d['VOCAB'], d['EMB_W']), jnp.float32)
    table = table.at[0:Vp, 0:E].set(params['page_embedding'])
    table = table.at[Vp:Vp + offset_size, E:2 * E].set(params['offset_embedding'])
    table = table.at[Vp + offset_size:, 2 * E:2 * E + PCE].set(params['pc_embedding'])

    # --- fused q/kv projection: blockdiag(Wq^T, [Wk^T | Wv^T]) ---
    wqkv = jnp.zeros((2 * E, d['QKV_W']), jnp.float32)
    wqkv = wqkv.at[0:E, 0:E].set(params['wq'].T)
    wqkv = wqkv.at[E:2 * E, E:2 * E].set(params['wk'].T)
    wqkv = wqkv.at[E:2 * E, 2 * E:3 * E].set(params['wv'].T)
    wo = params['wo'].T

    # --- LSTM input->gate weights in kernel gate order ---
    def gate_cols(wc_t, wf_t):
        cols = []
        for gi in GATE_ORDER:
            cols.append(wc_t[:, gi * H:(gi + 1) * H])
            cols.append(wf_t[:, gi * H:(gi + 1) * H])
        return jnp.concatenate(cols, axis=1)

    wih = gate_cols(params['coarse_w_ih'].T, params['fine_w_ih'].T)    # (80, 8H)
    wih_pc = wih[0:PCE]                  # pc input rows
    wih_page = wih[PCE:PCE + E]          # page input rows
    wih_attn = wih[PCE + E:PCE + 2 * E]  # attn-output input rows
    # rows follow fused-embedding column order [page | off(->0) | pc]
    wih_emb = jnp.concatenate(
        [wih_page, jnp.zeros((E, GW), jnp.float32), wih_pc], axis=0)   # (80, 8H)

    # --- recurrent weights: block-diag over [h_coarse | h_fine] ---
    z = jnp.zeros((H, H), jnp.float32)
    whc_t, whf_t = params['coarse_w_hh'].T, params['fine_w_hh'].T
    top, bot = [], []
    for gi in GATE_ORDER:
        top += [whc_t[:, gi * H:(gi + 1) * H], z]
        bot += [z, whf_t[:, gi * H:(gi + 1) * H]]
    whh = jnp.concatenate([jnp.concatenate(top, axis=1),
                           jnp.concatenate(bot, axis=1)], axis=0)      # (2H, 8H)

    bc = params['coarse_b_ih'] + params['coarse_b_hh']
    bf = params['fine_b_ih'] + params['fine_b_hh']
    b_gate = jnp.concatenate(
        [jnp.concatenate([bc[gi * H:(gi + 1) * H], bf[gi * H:(gi + 1) * H]])
         for gi in GATE_ORDER])                                        # (8H,)

    # --- output head: block-diag [page_linear | offset_linear], padded lane-dense ---
    whead = jnp.zeros((G, d['HEAD_W']), jnp.float32)
    whead = whead.at[0:H, 0:Vp].set(params['page_w'].T)
    whead = whead.at[H:G, Vp:Vp + Vo].set(params['off_w'].T)
    bhead = jnp.zeros((d['HEAD_W'],), jnp.float32)
    bhead = bhead.at[0:Vp].set(params['page_b'])
    bhead = bhead.at[Vp:Vp + Vo].set(params['off_b'])

    # --- pack everything into one bf16 slab (single HBM->VMEM DMA) ---
    SLAB_W = d['SLAB_W']

    def padw(a):
        return jnp.pad(a, ((0, 0), (0, SLAB_W - a.shape[1])))

    blocks = [table, wqkv, wo, wih_emb, wih_attn, whh, whead]
    assert all(b_.shape[0] % 8 == 0 for b_ in blocks)
    wslab = jnp.concatenate([padw(b_) for b_ in blocks], axis=0).astype(jnp.bfloat16)
    assert wslab.shape == (d['SLAB_ROWS'], SLAB_W), wslab.shape

    bias = jnp.zeros((2, SLAB_W), jnp.float32)
    bias = bias.at[0, 0:GW].set(b_gate)
    bias = bias.at[1, 0:d['HEAD_W']].set(bhead)

    return {'wslab': wslab, 'bias': bias}


# ----------------------------- full forward (one pallas_call) ----------------
def voyager_forward(fused, x, cfg):
    d = derive_dims(cfg)
    B = x.shape[0]
    L = cfg.sequence_length
    offset_size = 1 << cfg.offset_bits
    B_pad = max(8, 1 << (B - 1).bit_length())       # sublane-aligned power of two
    N = L * B_pad

    pcs = x[:, :L].astype(jnp.int32)
    pages = x[:, L:2 * L].astype(jnp.int32)
    offsets = x[:, 2 * L:3 * L].astype(jnp.int32)

    pad = ((0, B_pad - B), (0, 0))
    # time-major flat rows (r = l*B_pad + b); ids offset into the fused vocab
    page_i = jnp.pad(pages, pad).T.reshape(N, 1)
    off_i = jnp.pad(offsets, pad).T.reshape(N, 1) + PAGE_VOCAB
    pc_i = jnp.pad(pcs, pad).T.reshape(N, 1) + PAGE_VOCAB + offset_size
    idx = jnp.concatenate(
        [page_i, off_i, pc_i, jnp.full((N, 1), -1, jnp.int32)], axis=1)  # (N, 4)

    kernel = build_kernel(d, L, B_pad)
    out = pl.pallas_call(
        kernel,
        out_shape=jax.ShapeDtypeStruct((B_pad, d['HEAD_W']), jnp.float32),
        in_specs=[pl.BlockSpec(memory_space=pltpu.MemorySpace.VMEM)] * 3,
        out_specs=pl.BlockSpec(memory_space=pltpu.MemorySpace.VMEM),
        # NOTE(v7x): keep ungridded at B=2, L=8 — splitting across the two TCs
        # would cost more in per-core prologue than the compute it saves.
        # TODO(synk): if the forward is called for many independent request
        # groups per step, add a leading "parallel" grid axis over groups in a
        # single pallas_call to amortize launch / DMA-prologue cost.
    )(idx, fused['wslab'], fused['bias'])
    return out[:B, :d['Vp'] + d['Vo']]


# ----------------------------- pure-JAX reference -----------------------------
def voyager_reference(params, x, cfg):
    L = cfg.sequence_length
    E = cfg.page_embed_size
    pcs, pages, offsets = x[:, :L], x[:, L:2 * L], x[:, 2 * L:3 * L]
    pc_e = params['pc_embedding'][pcs]
    page_e = params['page_embedding'][pages]
    off_e = params['offset_embedding'][offsets]
    q = page_e @ params['wq'].T
    k = off_e @ params['wk'].T
    v = off_e @ params['wv'].T
    s = jnp.einsum('bqe,bke->bqk', q, k) / math.sqrt(E)
    p = jax.nn.softmax(s, axis=-1)
    attn = jnp.einsum('bqk,bke->bqe', p, v) @ params['wo'].T
    lstm_in = jnp.concatenate([pc_e, page_e, attn], axis=2)

    def lstm(x_seq, w_ih, w_hh, b_ih, b_hh):
        Bsz, H = x_seq.shape[0], w_hh.shape[1]
        h = jnp.zeros((Bsz, H), jnp.float32)
        c = jnp.zeros((Bsz, H), jnp.float32)
        for t in range(x_seq.shape[1]):
            g = x_seq[:, t] @ w_ih.T + h @ w_hh.T + b_ih + b_hh
            i = jax.nn.sigmoid(g[:, :H])
            f = jax.nn.sigmoid(g[:, H:2 * H])
            gg = jnp.tanh(g[:, 2 * H:3 * H])
            o = jax.nn.sigmoid(g[:, 3 * H:])
            c = f * c + i * gg
            h = o * jnp.tanh(c)
        return h

    hc = lstm(lstm_in, params['coarse_w_ih'], params['coarse_w_hh'],
              params['coarse_b_ih'], params['coarse_b_hh'])
    hf = lstm(lstm_in, params['fine_w_ih'], params['fine_w_hh'],
              params['fine_b_ih'], params['fine_b_hh'])
    cl = hc @ params['page_w'].T + params['page_b']
    fl = hf @ params['off_w'].T + params['off_b']
    return jnp.concatenate([cl, fl], axis=1)


# ----------------------------- main -------------------------------------------
if __name__ == "__main__":
    cfg = Config()
    assert cfg.page_embed_size == cfg.lstm_size, "mha embed_dim must equal lstm_size"
    assert cfg.lstm_layers == 1 and cfg.num_experts == 1
    assert not (cfg.use_contrastive or cfg.pc_localized or cfg.sequence_loss)
    # TODO(synk): ContrastiveEncoder branch (use_contrastive=True) is not defined
    # in the reference source and is not implemented here.

    key = jax.random.PRNGKey(0)
    k_params, k_pc, k_page, k_off = jax.random.split(key, 4)

    params = init_params(cfg, k_params)
    fused = fuse_params(params, cfg)

    B, L = cfg.batch_size, cfg.sequence_length
    offset_size = 1 << cfg.offset_bits
    pcs = jax.random.randint(k_pc, (B, L), 0, PC_VOCAB, jnp.int32)
    pages = jax.random.randint(k_page, (B, L), 0, PAGE_VOCAB, jnp.int32)
    offsets = jax.random.randint(k_off, (B, L), 0, offset_size, jnp.int32)
    x = jnp.concatenate([pcs, pages, offsets], axis=1)                  # (B, 3L) int32

    fwd = jax.jit(lambda f, xx: voyager_forward(f, xx, cfg))
    logits = fwd(fused, x)
    jax.block_until_ready(logits)

    assert logits.shape == (B, PAGE_VOCAB + offset_size), logits.shape
    assert bool(jnp.all(jnp.isfinite(logits)))

    with jax.default_matmul_precision("float32"):
        ref = voyager_reference(params, x, cfg)
    max_diff = float(jnp.max(jnp.abs(logits - ref)))
    assert max_diff < 5e-2, f"kernel/reference mismatch: max|diff|={max_diff}"

    print("KERNEL_OK")
</pallas_src>

<mosaic_0001>
module attributes {stable_mosaic.version = 11 : i64} {
  func.func @kernel(%arg0: memref<64x4xi32, #tpu.memory_space<vmem>>, %arg1: memref<592x256xbf16, #tpu.memory_space<vmem>>, %arg2: memref<2x256xf32, #tpu.memory_space<vmem>>, %arg3: memref<8x256xf32, #tpu.memory_space<vmem>>) attributes {dimension_semantics = [], scalar_prefetch = 0 : i64, scratch_operands = 0 : i64, tpu.core_type = #tpu.core_type<tc>} {
    %c0 = arith.constant 0 : index
    %c0_0 = arith.constant 0 : index
    %0 = vector.load %arg0[%c0, %c0_0] : memref<64x4xi32, #tpu.memory_space<vmem>>, vector<64x4xi32>
    %1 = tpu.iota {dimensions = array<i32: 1>} : vector<64x256xi32>
    %2 = vector.extract_strided_slice %0 {offsets = [0, 0], sizes = [64, 1], strides = [1, 1]} : vector<64x4xi32> to vector<64x1xi32>
    %3 = vector.broadcast %2 : vector<64x1xi32> to vector<64x256xi32>
    %4 = arith.cmpi eq, %1, %3 : vector<64x256xi32>
    %5 = vector.extract_strided_slice %0 {offsets = [0, 1], sizes = [64, 1], strides = [1, 1]} : vector<64x4xi32> to vector<64x1xi32>
    %6 = vector.broadcast %5 : vector<64x1xi32> to vector<64x256xi32>
    %7 = arith.cmpi eq, %1, %6 : vector<64x256xi32>
    %8 = arith.ori %4, %7 : vector<64x256xi1>
    %9 = vector.extract_strided_slice %0 {offsets = [0, 2], sizes = [64, 1], strides = [1, 1]} : vector<64x4xi32> to vector<64x1xi32>
    %10 = vector.broadcast %9 : vector<64x1xi32> to vector<64x256xi32>
    %11 = arith.cmpi eq, %1, %10 : vector<64x256xi32>
    %12 = arith.ori %8, %11 : vector<64x256xi1>
    %13 = arith.extui %12 : vector<64x256xi1> to vector<64x256xi32>
    %14 = arith.sitofp %13 : vector<64x256xi32> to vector<64x256xf32>
    %15 = arith.truncf %14 : vector<64x256xf32> to vector<64x256xbf16>
    %c0_1 = arith.constant 0 : index
    %c0_2 = arith.constant 0 : index
    %16 = vector.load %arg1[%c0_1, %c0_2] : memref<592x256xbf16, #tpu.memory_space<vmem>>, vector<256x80xbf16>
    %cst = arith.constant dense<0.000000e+00> : vector<64x80xf32>
    %17 = tpu.matmul %15, %16, %cst {dimension_numbers = #tpu.dot_dimension_numbers<[1], [0], [0], [1], [0, 0, 1, 1], [], []>} : vector<64x256xbf16>, vector<256x80xbf16>, vector<64x80xf32> -> vector<64x80xf32>
    %18 = vector.extract_strided_slice %17 {offsets = [0, 0], sizes = [64, 64], strides = [1, 1]} : vector<64x80xf32> to vector<64x64xf32>
    %19 = arith.truncf %18 : vector<64x64xf32> to vector<64x64xbf16>
    %c256 = arith.constant 256 : index
    %c0_3 = arith.constant 0 : index
    %20 = vector.load %arg1[%c256, %c0_3] : memref<592x256xbf16, #tpu.memory_space<vmem>>, vector<64x96xbf16>
    %cst_4 = arith.constant dense<0.000000e+00> : vector<64x96xf32>
    %21 = tpu.matmul %19, %20, %cst_4 {dimension_numbers = #tpu.dot_dimension_numbers<[1], [0], [0], [1], [0, 0, 1, 1], [], []>} : vector<64x64xbf16>, vector<64x96xbf16>, vector<64x96xf32> -> vector<64x96xf32>
    %22 = vector.extract_strided_slice %21 {offsets = [0, 0], sizes = [64, 32], strides = [1, 1]} : vector<64x96xf32> to vector<64x32xf32>
    %23 = vector.extract_strided_slice %21 {offsets = [0, 32], sizes = [64, 32], strides = [1, 1]} : vector<64x96xf32> to vector<64x32xf32>
    %24 = vector.extract_strided_slice %21 {offsets = [0, 64], sizes = [64, 32], strides = [1, 1]} : vector<64x96xf32> to vector<64x32xf32>
    %25 = arith.truncf %22 : vector<64x32xf32> to vector<64x32xbf16>
    %26 = arith.truncf %23 : vector<64x32xf32> to vector<64x32xbf16>
    %cst_5 = arith.constant dense<0.000000e+00> : vector<64x64xf32>
    %27 = tpu.matmul %25, %26, %cst_5 {dimension_numbers = #tpu.dot_dimension_numbers<[1], [1], [0], [0], [0, 0, 1, 0], [], []>} : vector<64x32xbf16>, vector<64x32xbf16>, vector<64x64xf32> -> vector<64x64xf32>
    %28 = tpu.iota {dimensions = array<i32: 0>} : vector<64x64xi32>
    %c7_i32 = arith.constant 7 : i32
    %29 = vector.broadcast %c7_i32 : i32 to vector<64x64xi32>
    %30 = arith.andi %28, %29 : vector<64x64xi32>
    %31 = tpu.iota {dimensions = array<i32: 1>} : vector<64x64xi32>
    %c7_i32_6 = arith.constant 7 : i32
    %32 = vector.broadcast %c7_i32_6 : i32 to vector<64x64xi32>
    %33 = arith.andi %31, %32 : vector<64x64xi32>
    %cst_7 = arith.constant 0.176776692 : f32
    %34 = vector.broadcast %cst_7 : f32 to vector<64x64xf32>
    %35 = arith.mulf %27, %34 : vector<64x64xf32>
    %36 = arith.cmpi eq, %30, %33 : vector<64x64xi32>
    %cst_8 = arith.constant 0.000000e+00 : f32
    %cst_9 = arith.constant -1.000000e+30 : f32
    %37 = vector.broadcast %cst_8 : f32 to vector<64x64xf32>
    %38 = vector.broadcast %cst_9 : f32 to vector<64x64xf32>
    %39 = arith.select %36, %37, %38 : vector<64x64xi1>, vector<64x64xf32>
    %40 = arith.addf %35, %39 : vector<64x64xf32>
    %cst_10 = arith.constant dense<0xFF800000> : vector<64xf32>
    %41 = vector.multi_reduction <maximumf>, %40, %cst_10 [1] : vector<64x64xf32> to vector<64xf32>
    %42 = vector.shape_cast %41 : vector<64xf32> to vector<64x1xf32>
    %43 = vector.broadcast %42 : vector<64x1xf32> to vector<64x64xf32>
    %44 = arith.subf %40, %43 : vector<64x64xf32>
    %45 = math.exp %44 : vector<64x64xf32>
    %cst_11 = arith.constant dense<0.000000e+00> : vector<64xf32>
    %46 = vector.multi_reduction <add>, %45, %cst_11 [1] : vector<64x64xf32> to vector<64xf32>
    %47 = vector.shape_cast %46 : vector<64xf32> to vector<64x1xf32>
    %48 = tpu.reciprocal %47 {approx = true} : vector<64x1xf32> -> vector<64x1xf32>
    %49 = vector.broadcast %48 : vector<64x1xf32> to vector<64x64xf32>
    %50 = arith.mulf %45, %49 : vector<64x64xf32>
    %51 = arith.truncf %50 : vector<64x64xf32> to vector<64x64xbf16>
    %52 = arith.truncf %24 : vector<64x32xf32> to vector<64x32xbf16>
    %cst_12 = arith.constant dense<0.000000e+00> : vector<64x32xf32>
    %53 = tpu.matmul %51, %52, %cst_12 {dimension_numbers = #tpu.dot_dimension_numbers<[1], [0], [0], [1], [0, 0, 1, 1], [], []>} : vector<64x64xbf16>, vector<64x32xbf16>, vector<64x32xf32> -> vector<64x32xf32>
    %54 = arith.truncf %53 : vector<64x32xf32> to vector<64x32xbf16>
    %c320 = arith.constant 320 : index
    %c0_13 = arith.constant 0 : index
    %55 = vector.load %arg1[%c320, %c0_13] : memref<592x256xbf16, #tpu.memory_space<vmem>>, vector<32x32xbf16>
    %cst_14 = arith.constant dense<0.000000e+00> : vector<64x32xf32>
    %56 = tpu.matmul %54, %55, %cst_14 {dimension_numbers = #tpu.dot_dimension_numbers<[1], [0], [0], [1], [0, 0, 1, 1], [], []>} : vector<64x32xbf16>, vector<32x32xbf16>, vector<64x32xf32> -> vector<64x32xf32>
    %57 = arith.truncf %17 : vector<64x80xf32> to vector<64x80xbf16>
    %c352 = arith.constant 352 : index
    %c0_15 = arith.constant 0 : index
    %58 = vector.load %arg1[%c352, %c0_15] : memref<592x256xbf16, #tpu.memory_space<vmem>>, vector<80x256xbf16>
    %cst_16 = arith.constant dense<0.000000e+00> : vector<64x256xf32>
    %59 = tpu.matmul %57, %58, %cst_16 {dimension_numbers = #tpu.dot_dimension_numbers<[1], [0], [0], [1], [0, 0, 1, 1], [], []>} : vector<64x80xbf16>, vector<80x256xbf16>, vector<64x256xf32> -> vector<64x256xf32>
    %60 = arith.truncf %56 : vector<64x32xf32> to vector<64x32xbf16>
    %c432 = arith.constant 432 : index
    %c0_17 = arith.constant 0 : index
    %61 = vector.load %arg1[%c432, %c0_17] : memref<592x256xbf16, #tpu.memory_space<vmem>>, vector<32x256xbf16>
    %cst_18 = arith.constant dense<0.000000e+00> : vector<64x256xf32>
    %62 = tpu.matmul %60, %61, %cst_18 {dimension_numbers = #tpu.dot_dimension_numbers<[1], [0], [0], [1], [0, 0, 1, 1], [], []>} : vector<64x32xbf16>, vector<32x256xbf16>, vector<64x256xf32> -> vector<64x256xf32>
    %63 = arith.addf %59, %62 : vector<64x256xf32>
    %c0_19 = arith.constant 0 : index
    %c0_20 = arith.constant 0 : index
    %64 = vector.load %arg2[%c0_19, %c0_20] : memref<2x256xf32, #tpu.memory_space<vmem>>, vector<1x256xf32>
    %65 = vector.broadcast %64 : vector<1x256xf32> to vector<64x256xf32>
    %66 = arith.addf %63, %65 : vector<64x256xf32>
    %c464 = arith.constant 464 : index
    %c0_21 = arith.constant 0 : index
    %67 = vector.load %arg1[%c464, %c0_21] : memref<592x256xbf16, #tpu.memory_space<vmem>>, vector<64x256xbf16>
    %cst_22 = arith.constant 0.000000e+00 : f32
    %68 = vector.broadcast %cst_22 : f32 to vector<8x64xf32>
    %cst_23 = arith.constant 0.000000e+00 : f32
    %69 = vector.broadcast %cst_23 : f32 to vector<8x64xf32>
    %70 = vector.extract_strided_slice %66 {offsets = [0, 0], sizes = [8, 256], strides = [1, 1]} : vector<64x256xf32> to vector<8x256xf32>
    %71 = arith.truncf %68 : vector<8x64xf32> to vector<8x64xbf16>
    %cst_24 = arith.constant dense<0.000000e+00> : vector<8x256xf32>
    %72 = tpu.matmul %71, %67, %cst_24 {dimension_numbers = #tpu.dot_dimension_numbers<[1], [0], [0], [1], [0, 0, 1, 1], [], []>} : vector<8x64xbf16>, vector<64x256xbf16>, vector<8x256xf32> -> vector<8x256xf32>
    %73 = arith.addf %70, %72 : vector<8x256xf32>
    %74 = vector.extract_strided_slice %73 {offsets = [0, 0], sizes = [8, 192], strides = [1, 1]} : vector<8x256xf32> to vector<8x192xf32>
    %75 = arith.negf %74 : vector<8x192xf32>
    %76 = math.exp %75 : vector<8x192xf32>
    %cst_25 = arith.constant 1.000000e+00 : f32
    %77 = vector.broadcast %cst_25 : f32 to vector<8x192xf32>
    %78 = arith.addf %77, %76 : vector<8x192xf32>
    %79 = arith.divf %77, %78 : vector<8x192xf32>
    %80 = vector.extract_strided_slice %73 {offsets = [0, 192], sizes = [8, 64], strides = [1, 1]} : vector<8x256xf32> to vector<8x64xf32>
    %81 = math.tanh %80 : vector<8x64xf32>
    %82 = vector.extract_strided_slice %79 {offsets = [0, 64], sizes = [8, 64], strides = [1, 1]} : vector<8x192xf32> to vector<8x64xf32>
    %83 = arith.mulf %82, %69 : vector<8x64xf32>
    %84 = vector.extract_strided_slice %79 {offsets = [0, 0], sizes = [8, 64], strides = [1, 1]} : vector<8x192xf32> to vector<8x64xf32>
    %85 = arith.mulf %84, %81 : vector<8x64xf32>
    %86 = arith.addf %83, %85 : vector<8x64xf32>
    %87 = vector.extract_strided_slice %79 {offsets = [0, 128], sizes = [8, 64], strides = [1, 1]} : vector<8x192xf32> to vector<8x64xf32>
    %88 = math.tanh %86 : vector<8x64xf32>
    %89 = arith.mulf %87, %88 : vector<8x64xf32>
    %90 = vector.extract_strided_slice %66 {offsets = [8, 0], sizes = [8, 256], strides = [1, 1]} : vector<64x256xf32> to vector<8x256xf32>
    %91 = arith.truncf %89 : vector<8x64xf32> to vector<8x64xbf16>
    %cst_26 = arith.constant dense<0.000000e+00> : vector<8x256xf32>
    %92 = tpu.matmul %91, %67, %cst_26 {dimension_numbers = #tpu.dot_dimension_numbers<[1], [0], [0], [1], [0, 0, 1, 1], [], []>} : vector<8x64xbf16>, vector<64x256xbf16>, vector<8x256xf32> -> vector<8x256xf32>
    %93 = arith.addf %90, %92 : vector<8x256xf32>
    %94 = vector.extract_strided_slice %93 {offsets = [0, 0], sizes = [8, 192], strides = [1, 1]} : vector<8x256xf32> to vector<8x192xf32>
    %95 = arith.negf %94 : vector<8x192xf32>
    %96 = math.exp %95 : vector<8x192xf32>
    %cst_27 = arith.constant 1.000000e+00 : f32
    %97 = vector.broadcast %cst_27 : f32 to vector<8x192xf32>
    %98 = arith.addf %97, %96 : vector<8x192xf32>
    %99 = arith.divf %97, %98 : vector<8x192xf32>
    %100 = vector.extract_strided_slice %93 {offsets = [0, 192], sizes = [8, 64], strides = [1, 1]} : vector<8x256xf32> to vector<8x64xf32>
    %101 = math.tanh %100 : vector<8x64xf32>
    %102 = vector.extract_strided_slice %99 {offsets = [0, 64], sizes = [8, 64], strides = [1, 1]} : vector<8x192xf32> to vector<8x64xf32>
    %103 = arith.mulf %102, %86 : vector<8x64xf32>
    %104 = vector.extract_strided_slice %99 {offsets = [0, 0], sizes = [8, 64], strides = [1, 1]} : vector<8x192xf32> to vector<8x64xf32>
    %105 = arith.mulf %104, %101 : vector<8x64xf32>
    %106 = arith.addf %103, %105 : vector<8x64xf32>
    %107 = vector.extract_strided_slice %99 {offsets = [0, 128], sizes = [8, 64], strides = [1, 1]} : vector<8x192xf32> to vector<8x64xf32>
    %108 = math.tanh %106 : vector<8x64xf32>
    %109 = arith.mulf %107, %108 : vector<8x64xf32>
    %110 = vector.extract_strided_slice %66 {offsets = [16, 0], sizes = [8, 256], strides = [1, 1]} : vector<64x256xf32> to vector<8x256xf32>
    %111 = arith.truncf %109 : vector<8x64xf32> to vector<8x64xbf16>
    %cst_28 = arith.constant dense<0.000000e+00> : vector<8x256xf32>
    %112 = tpu.matmul %111, %67, %cst_28 {dimension_numbers = #tpu.dot_dimension_numbers<[1], [0], [0], [1], [0, 0, 1, 1], [], []>} : vector<8x64xbf16>, vector<64x256xbf16>, vector<8x256xf32> -> vector<8x256xf32>
    %113 = arith.addf %110, %112 : vector<8x256xf32>
    %114 = vector.extract_strided_slice %113 {offsets = [0, 0], sizes = [8, 192], strides = [1, 1]} : vector<8x256xf32> to vector<8x192xf32>
    %115 = arith.negf %114 : vector<8x192xf32>
    %116 = math.exp %115 : vector<8x192xf32>
    %cst_29 = arith.constant 1.000000e+00 : f32
    %117 = vector.broadcast %cst_29 : f32 to vector<8x192xf32>
    %118 = arith.addf %117, %116 : vector<8x192xf32>
    %119 = arith.divf %117, %118 : vector<8x192xf32>
    %120 = vector.extract_strided_slice %113 {offsets = [0, 192], sizes = [8, 64], strides = [1, 1]} : vector<8x256xf32> to vector<8x64xf32>
    %121 = math.tanh %120 : vector<8x64xf32>
    %122 = vector.extract_strided_slice %119 {offsets = [0, 64], sizes = [8, 64], strides = [1, 1]} : vector<8x192xf32> to vector<8x64xf32>
    %123 = arith.mulf %122, %106 : vector<8x64xf32>
    %124 = vector.extract_strided_slice %119 {offsets = [0, 0], sizes = [8, 64], strides = [1, 1]} : vector<8x192xf32> to vector<8x64xf32>
    %125 = arith.mulf %124, %121 : vector<8x64xf32>
    %126 = arith.addf %123, %125 : vector<8x64xf32>
    %127 = vector.extract_strided_slice %119 {offsets = [0, 128], sizes = [8, 64], strides = [1, 1]} : vector<8x192xf32> to vector<8x64xf32>
    %128 = math.tanh %126 : vector<8x64xf32>
    %129 = arith.mulf %127, %128 : vector<8x64xf32>
    %130 = vector.extract_strided_slice %66 {offsets = [24, 0], sizes = [8, 256], strides = [1, 1]} : vector<64x256xf32> to vector<8x256xf32>
    %131 = arith.truncf %129 : vector<8x64xf32> to vector<8x64xbf16>
    %cst_30 = arith.constant dense<0.000000e+00> : vector<8x256xf32>
    %132 = tpu.matmul %131, %67, %cst_30 {dimension_numbers = #tpu.dot_dimension_numbers<[1], [0], [0], [1], [0, 0, 1, 1], [], []>} : vector<8x64xbf16>, vector<64x256xbf16>, vector<8x256xf32> -> vector<8x256xf32>
    %133 = arith.addf %130, %132 : vector<8x256xf32>
    %134 = vector.extract_strided_slice %133 {offsets = [0, 0], sizes = [8, 192], strides = [1, 1]} : vector<8x256xf32> to vector<8x192xf32>
    %135 = arith.negf %134 : vector<8x192xf32>
    %136 = math.exp %135 : vector<8x192xf32>
    %cst_31 = arith.constant 1.000000e+00 : f32
    %137 = vector.broadcast %cst_31 : f32 to vector<8x192xf32>
    %138 = arith.addf %137, %136 : vector<8x192xf32>
    %139 = arith.divf %137, %138 : vector<8x192xf32>
    %140 = vector.extract_strided_slice %133 {offsets = [0, 192], sizes = [8, 64], strides = [1, 1]} : vector<8x256xf32> to vector<8x64xf32>
    %141 = math.tanh %140 : vector<8x64xf32>
    %142 = vector.extract_strided_slice %139 {offsets = [0, 64], sizes = [8, 64], strides = [1, 1]} : vector<8x192xf32> to vector<8x64xf32>
    %143 = arith.mulf %142, %126 : vector<8x64xf32>
    %144 = vector.extract_strided_slice %139 {offsets = [0, 0], sizes = [8, 64], strides = [1, 1]} : vector<8x192xf32> to vector<8x64xf32>
    %145 = arith.mulf %144, %141 : vector<8x64xf32>
    %146 = arith.addf %143, %145 : vector<8x64xf32>
    %147 = vector.extract_strided_slice %139 {offsets = [0, 128], sizes = [8, 64], strides = [1, 1]} : vector<8x192xf32> to vector<8x64xf32>
    %148 = math.tanh %146 : vector<8x64xf32>
    %149 = arith.mulf %147, %148 : vector<8x64xf32>
    %150 = vector.extract_strided_slice %66 {offsets = [32, 0], sizes = [8, 256], strides = [1, 1]} : vector<64x256xf32> to vector<8x256xf32>
    %151 = arith.truncf %149 : vector<8x64xf32> to vector<8x64xbf16>
    %cst_32 = arith.constant dense<0.000000e+00> : vector<8x256xf32>
    %152 = tpu.matmul %151, %67, %cst_32 {dimension_numbers = #tpu.dot_dimension_numbers<[1], [0], [0], [1], [0, 0, 1, 1], [], []>} : vector<8x64xbf16>, vector<64x256xbf16>, vector<8x256xf32> -> vector<8x256xf32>
    %153 = arith.addf %150, %152 : vector<8x256xf32>
    %154 = vector.extract_strided_slice %153 {offsets = [0, 0], sizes = [8, 192], strides = [1, 1]} : vector<8x256xf32> to vector<8x192xf32>
    %155 = arith.negf %154 : vector<8x192xf32>
    %156 = math.exp %155 : vector<8x192xf32>
    %cst_33 = arith.constant 1.000000e+00 : f32
    %157 = vector.broadcast %cst_33 : f32 to vector<8x192xf32>
    %158 = arith.addf %157, %156 : vector<8x192xf32>
    %159 = arith.divf %157, %158 : vector<8x192xf32>
    %160 = vector.extract_strided_slice %153 {offsets = [0, 192], sizes = [8, 64], strides = [1, 1]} : vector<8x256xf32> to vector<8x64xf32>
    %161 = math.tanh %160 : vector<8x64xf32>
    %162 = vector.extract_strided_slice %159 {offsets = [0, 64], sizes = [8, 64], strides = [1, 1]} : vector<8x192xf32> to vector<8x64xf32>
    %163 = arith.mulf %162, %146 : vector<8x64xf32>
    %164 = vector.extract_strided_slice %159 {offsets = [0, 0], sizes = [8, 64], strides = [1, 1]} : vector<8x192xf32> to vector<8x64xf32>
    %165 = arith.mulf %164, %161 : vector<8x64xf32>
    %166 = arith.addf %163, %165 : vector<8x64xf32>
    %167 = vector.extract_strided_slice %159 {offsets = [0, 128], sizes = [8, 64], strides = [1, 1]} : vector<8x192xf32> to vector<8x64xf32>
    %168 = math.tanh %166 : vector<8x64xf32>
    %169 = arith.mulf %167, %168 : vector<8x64xf32>
    %170 = vector.extract_strided_slice %66 {offsets = [40, 0], sizes = [8, 256], strides = [1, 1]} : vector<64x256xf32> to vector<8x256xf32>
    %171 = arith.truncf %169 : vector<8x64xf32> to vector<8x64xbf16>
    %cst_34 = arith.constant dense<0.000000e+00> : vector<8x256xf32>
    %172 = tpu.matmul %171, %67, %cst_34 {dimension_numbers = #tpu.dot_dimension_numbers<[1], [0], [0], [1], [0, 0, 1, 1], [], []>} : vector<8x64xbf16>, vector<64x256xbf16>, vector<8x256xf32> -> vector<8x256xf32>
    %173 = arith.addf %170, %172 : vector<8x256xf32>
    %174 = vector.extract_strided_slice %173 {offsets = [0, 0], sizes = [8, 192], strides = [1, 1]} : vector<8x256xf32> to vector<8x192xf32>
    %175 = arith.negf %174 : vector<8x192xf32>
    %176 = math.exp %175 : vector<8x192xf32>
    %cst_35 = arith.constant 1.000000e+00 : f32
    %177 = vector.broadcast %cst_35 : f32 to vector<8x192xf32>
    %178 = arith.addf %177, %176 : vector<8x192xf32>
    %179 = arith.divf %177, %178 : vector<8x192xf32>
    %180 = vector.extract_strided_slice %173 {offsets = [0, 192], sizes = [8, 64], strides = [1, 1]} : vector<8x256xf32> to vector<8x64xf32>
    %181 = math.tanh %180 : vector<8x64xf32>
    %182 = vector.extract_strided_slice %179 {offsets = [0, 64], sizes = [8, 64], strides = [1, 1]} : vector<8x192xf32> to vector<8x64xf32>
    %183 = arith.mulf %182, %166 : vector<8x64xf32>
    %184 = vector.extract_strided_slice %179 {offsets = [0, 0], sizes = [8, 64], strides = [1, 1]} : vector<8x192xf32> to vector<8x64xf32>
    %185 = arith.mulf %184, %181 : vector<8x64xf32>
    %186 = arith.addf %183, %185 : vector<8x64xf32>
    %187 = vector.extract_strided_slice %179 {offsets = [0, 128], sizes = [8, 64], strides = [1, 1]} : vector<8x192xf32> to vector<8x64xf32>
    %188 = math.tanh %186 : vector<8x64xf32>
    %189 = arith.mulf %187, %188 : vector<8x64xf32>
    %190 = vector.extract_strided_slice %66 {offsets = [48, 0], sizes = [8, 256], strides = [1, 1]} : vector<64x256xf32> to vector<8x256xf32>
    %191 = arith.truncf %189 : vector<8x64xf32> to vector<8x64xbf16>
    %cst_36 = arith.constant dense<0.000000e+00> : vector<8x256xf32>
    %192 = tpu.matmul %191, %67, %cst_36 {dimension_numbers = #tpu.dot_dimension_numbers<[1], [0], [0], [1], [0, 0, 1, 1], [], []>} : vector<8x64xbf16>, vector<64x256xbf16>, vector<8x256xf32> -> vector<8x256xf32>
    %193 = arith.addf %190, %192 : vector<8x256xf32>
    %194 = vector.extract_strided_slice %193 {offsets = [0, 0], sizes = [8, 192], strides = [1, 1]} : vector<8x256xf32> to vector<8x192xf32>
    %195 = arith.negf %194 : vector<8x192xf32>
    %196 = math.exp %195 : vector<8x192xf32>
    %cst_37 = arith.constant 1.000000e+00 : f32
    %197 = vector.broadcast %cst_37 : f32 to vector<8x192xf32>
    %198 = arith.addf %197, %196 : vector<8x192xf32>
    %199 = arith.divf %197, %198 : vector<8x192xf32>
    %200 = vector.extract_strided_slice %193 {offsets = [0, 192], sizes = [8, 64], strides = [1, 1]} : vector<8x256xf32> to vector<8x64xf32>
    %201 = math.tanh %200 : vector<8x64xf32>
    %202 = vector.extract_strided_slice %199 {offsets = [0, 64], sizes = [8, 64], strides = [1, 1]} : vector<8x192xf32> to vector<8x64xf32>
    %203 = arith.mulf %202, %186 : vector<8x64xf32>
    %204 = vector.extract_strided_slice %199 {offsets = [0, 0], sizes = [8, 64], strides = [1, 1]} : vector<8x192xf32> to vector<8x64xf32>
    %205 = arith.mulf %204, %201 : vector<8x64xf32>
    %206 = arith.addf %203, %205 : vector<8x64xf32>
    %207 = vector.extract_strided_slice %199 {offsets = [0, 128], sizes = [8, 64], strides = [1, 1]} : vector<8x192xf32> to vector<8x64xf32>
    %208 = math.tanh %206 : vector<8x64xf32>
    %209 = arith.mulf %207, %208 : vector<8x64xf32>
    %210 = vector.extract_strided_slice %66 {offsets = [56, 0], sizes = [8, 256], strides = [1, 1]} : vector<64x256xf32> to vector<8x256xf32>
    %211 = arith.truncf %209 : vector<8x64xf32> to vector<8x64xbf16>
    %cst_38 = arith.constant dense<0.000000e+00> : vector<8x256xf32>
    %212 = tpu.matmul %211, %67, %cst_38 {dimension_numbers = #tpu.dot_dimension_numbers<[1], [0], [0], [1], [0, 0, 1, 1], [], []>} : vector<8x64xbf16>, vector<64x256xbf16>, vector<8x256xf32> -> vector<8x256xf32>
    %213 = arith.addf %210, %212 : vector<8x256xf32>
    %214 = vector.extract_strided_slice %213 {offsets = [0, 0], sizes = [8, 192], strides = [1, 1]} : vector<8x256xf32> to vector<8x192xf32>
    %215 = arith.negf %214 : vector<8x192xf32>
    %216 = math.exp %215 : vector<8x192xf32>
    %cst_39 = arith.constant 1.000000e+00 : f32
    %217 = vector.broadcast %cst_39 : f32 to vector<8x192xf32>
    %218 = arith.addf %217, %216 : vector<8x192xf32>
    %219 = arith.divf %217, %218 : vector<8x192xf32>
    %220 = vector.extract_strided_slice %213 {offsets = [0, 192], sizes = [8, 64], strides = [1, 1]} : vector<8x256xf32> to vector<8x64xf32>
    %221 = math.tanh %220 : vector<8x64xf32>
    %222 = vector.extract_strided_slice %219 {offsets = [0, 64], sizes = [8, 64], strides = [1, 1]} : vector<8x192xf32> to vector<8x64xf32>
    %223 = arith.mulf %222, %206 : vector<8x64xf32>
    %224 = vector.extract_strided_slice %219 {offsets = [0, 0], sizes = [8, 64], strides = [1, 1]} : vector<8x192xf32> to vector<8x64xf32>
    %225 = arith.mulf %224, %221 : vector<8x64xf32>
    %226 = arith.addf %223, %225 : vector<8x64xf32>
    %227 = vector.extract_strided_slice %219 {offsets = [0, 128], sizes = [8, 64], strides = [1, 1]} : vector<8x192xf32> to vector<8x64xf32>
    %228 = math.tanh %226 : vector<8x64xf32>
    %229 = arith.mulf %227, %228 : vector<8x64xf32>
    %230 = arith.truncf %229 : vector<8x64xf32> to vector<8x64xbf16>
    %c528 = arith.constant 528 : index
    %c0_40 = arith.constant 0 : index
    %231 = vector.load %arg1[%c528, %c0_40] : memref<592x256xbf16, #tpu.memory_space<vmem>>, vector<64x256xbf16>
    %cst_41 = arith.constant dense<0.000000e+00> : vector<8x256xf32>
    %232 = tpu.matmul %230, %231, %cst_41 {dimension_numbers = #tpu.dot_dimension_numbers<[1], [0], [0], [1], [0, 0, 1, 1], [], []>} : vector<8x64xbf16>, vector<64x256xbf16>, vector<8x256xf32> -> vector<8x256xf32>
    %c1 = arith.constant 1 : index
    %c0_42 = arith.constant 0 : index
    %233 = vector.load %arg2[%c1, %c0_42] : memref<2x256xf32, #tpu.memory_space<vmem>>, vector<1x256xf32>
    %234 = vector.broadcast %233 : vector<1x256xf32> to vector<8x256xf32>
    %235 = arith.addf %232, %234 : vector<8x256xf32>
    %c0_43 = arith.constant 0 : index
    %c0_44 = arith.constant 0 : index
    %236 = vector.load %arg3[%c0_43, %c0_44] : memref<8x256xf32, #tpu.memory_space<vmem>>, vector<8x256xf32>
    tpu.vector_store %arg3[%c0_43, %c0_44], %235 {strides = array<i32>} : memref<8x256xf32, #tpu.memory_space<vmem>>, vector<8x256xf32>,
    return
  }
}

</mosaic_0001>

<bundles_post_ra>
// kernel: _lambda_.1
= control target key start
LH: loop header
LB: loop body
LE: loop exit
PB: predicated region body
PF: predicated region fallthrough
CT: control target
= control target key end

     0   :  { %8 = vsyncpa [#allocation3], 0  ;;  %s2453_s15 = smov [#allocation2]   ;;  %s2454_s17 = smov 128   ;;  %s2988_s0 = inlined_call_operand.vmem [shape: s32[64,4], index: 0, kind: input, shape index: {}]   ;;  %s2989_s1 = inlined_call_operand.hbm [shape: bf16[592,256], index: 1, kind: input, shape index: {}]   ;;  %s2990_s2 = inlined_call_operand.vmem [shape: f32[2,256], index: 2, kind: input, shape index: {}]   ;;  %s2991_s3 = inlined_call_operand.vmem [shape: f32[8,256], index: 3, kind: output, shape index: {}]  }
   0x1   :  { %s15_s14 = sshll.u32 %s2989_s1, 4  ;;  %s17_s16 = sshll.u32 %s2453_s15, 4  ;;  %s16_s14 = int_to_ptr.hbm [resolvable:$true] %s15_s14  ;;  %s18_s16 = int_to_ptr.vmem [resolvable:$true] %s17_s16 }
   0x2   :  { %s2455_s18 = smov 8  }
   0x3   :  { %23 = dma.hbm_to_vmem [thread:$0]  %s16_s14, 9472, %s18_s16, [#allocation3], %s2454_s17, %s2454_s17, %s2455_s18  }
   0x4   :  { %2451 = dma.done.wait [#allocation3], 9472  }
   0x5   :  { %2452 = vsyncadd [#allocation3], 4294957824  ;;  %v2456_v0 = vmov 1   ;;  %v2457_v1 = vmov 0   ;;  %v2458_v2 = vmov 2   ;;  %v31_v3 = vld [vmem:[%s2988_s0] sm:$0xff]  ;;  %v39_v60 = vlaneseq }
   0x6   :  { %2282 = vset.pattern.permute.xlu1 %v2456_v0  ;;  %2281 = vset.pattern.permute.xlu0 %v2457_v1  ;;  %v32_v4 = vld [vmem:[%s2988_s0 + $0x8] sm:$0xff]  ;;  %v33_v5 = vld [vmem:[%s2988_s0 + $0x10] sm:$0xff]  ;;  %v34_v6 = vld [vmem:[%s2988_s0 + $0x18] sm:$0xff]  ;;  %s2461_s7 = smov 64  }
   0x7   :  { %2283 = vset.pattern.permute.xlu2 %v2458_v2  ;;  %83 = vperm.xlu1 %2282, %v31_v3   ;;  %v35_v7 = vld [vmem:[%s2988_s0 + $0x20] sm:$0xff]  ;;  %v36_v8 = vld [vmem:[%s2988_s0 + $0x28] sm:$0xff]  ;;  %v1960_v9 = vld [vmem:[#allocation2 + $0x70] sm:$0xf]  ;;  %v2529_v61 = vand.u32 127, %v39_v60 }
   0x8   :  { %43 = vperm.xlu0 %2281, %v31_v3   ;;  %139 = vperm.xlu2 %2283, %v31_v3   ;;  %v2226_v10 = vld [vmem:[#allocation2 + $0x74] sm:$0xf0]  ;;  %v1992_v11 = vld [vmem:[#allocation2 + $0xf0] sm:$0xf]  ;;  %v1956_v14 = vld [vmem:[#allocation2 + $0x60] sm:$0xf] }
   0x9   :  { %v1961_v12 = vor.u32 %v2226_v10, %v1960_v9  ;;  %v2234_v13 = vld [vmem:[#allocation2 + $0xf4] sm:$0xf0]  ;;  %v2225_v15 = vld [vmem:[#allocation2 + $0x64] sm:$0xf0]  ;;  %v1988_v17 = vld [vmem:[#allocation2 + $0xe0] sm:$0xf] }
   0xa   :  { %v1993_v16 = vor.u32 %v2234_v13, %v1992_v11  ;;  %v2233_v18 = vld [vmem:[#allocation2 + $0xe4] sm:$0xf0]  ;;  %v1957_v19 = vor.u32 %v2225_v15, %v1956_v14  ;;  %v1952_v21 = vld [vmem:[#allocation2 + $0x50] sm:$0xf]  ;;  %v2224_v22 = vld [vmem:[#allocation2 + $0x54] sm:$0xf0] }
   0xb   :  { %362 = vmatpush.bf16.msra.mxu0 %v1961_v12  ;;  %v1989_v20 = vor.u32 %v2233_v18, %v1988_v17  ;;  %v1984_v23 = vld [vmem:[#allocation2 + $0xd0] sm:$0xf]  ;;  %v2232_v24 = vld [vmem:[#allocation2 + $0xd4] sm:$0xf0]  ;;  %v1953_v25 = vor.u32 %v2224_v22, %v1952_v21  ;;  %v1948_v27 = vld [vmem:[#allocation2 + $0x40] sm:$0xf] }
   0xc   :  { %391 = vmatpush.bf16.msra.mxu1 %v1993_v16  ;;  %v1985_v26 = vor.u32 %v2232_v24, %v1984_v23  ;;  %v2223_v28 = vld [vmem:[#allocation2 + $0x44] sm:$0xf0]  ;;  %v1980_v29 = vld [vmem:[#allocation2 + $0xc0] sm:$0xf]  ;;  %v37_v31 = vld [vmem:[%s2988_s0 + $0x30] sm:$0xff]  ;;  %v2532_v63 = vadd.s32 128, %v2529_v61 }
   0xd   :  { %v2231_v30 = vld [vmem:[#allocation2 + $0xc4] sm:$0xf0]  ;;  %v1949_v32 = vor.u32 %v2223_v28, %v1948_v27  ;;  %v38_v34 = vld [vmem:[%s2988_s0 + $0x38] sm:$0xff]  ;;  %v1944_v35 = vld [vmem:[#allocation2 + $0x30] sm:$0xf]  ;;  %s2460_s0 = smov 96  }
   0xe   :  { %v1981_v33 = vor.u32 %v2231_v30, %v1980_v29  ;;  %v2222_v36 = vld [vmem:[#allocation2 + $0x34] sm:$0xf0]  ;;  %v1976_v37 = vld [vmem:[#allocation2 + $0xb0] sm:$0xf]  ;;  %v1940_v41 = vld [vmem:[#allocation2 + $0x20] sm:$0xf] }
   0xf   :  { %86 = vperm.xlu1 %2282, %v32_v4   ;;  %363 = vmatpush.bf16.msra.mxu0 %v1957_v19  ;;  %v1945_v38 = vor.u32 %v2222_v36, %v1944_v35  ;;  %v2230_v39 = vld [vmem:[#allocation2 + $0xb4] sm:$0xf0]  ;;  %v2221_v42 = vld [vmem:[#allocation2 + $0x24] sm:$0xf0]  ;;  %v1972_v43 = vld [vmem:[#allocation2 + $0xa0] sm:$0xf] }
  0x10   :  { %46 = vperm.xlu0 %2281, %v32_v4   ;;  %142 = vperm.xlu2 %2283, %v32_v4   ;;  %v1977_v40 = vor.u32 %v2230_v39, %v1976_v37  ;;  %v1941_v44 = vor.u32 %v2221_v42, %v1940_v41  ;;  %v2229_v45 = vld [vmem:[#allocation2 + $0xa4] sm:$0xf0]  ;;  %v1936_v47 = vld [vmem:[#allocation2 + $0x10] sm:$0xf]  ;;  %v2220_v48 = vld [vmem:[#allocation2 + $0x14] sm:$0xf0] }
  0x11   :  { %392 = vmatpush.bf16.msra.mxu1 %v1989_v20  ;;  %v1973_v46 = vor.u32 %v2229_v45, %v1972_v43  ;;  %v1968_v49 = vld [vmem:[#allocation2 + $0x90] sm:$0xf]  ;;  %v1937_v50 = vor.u32 %v2220_v48, %v1936_v47  ;;  %v2228_v51 = vld [vmem:[#allocation2 + $0x94] sm:$0xf0]  ;;  %v1932_v53 = vld [vmem:[#allocation2] sm:$0xf] }
  0x12   :  { %v1969_v52 = vor.u32 %v2228_v51, %v1968_v49  ;;  %v2219_v54 = vld [vmem:[#allocation2 + $0x4] sm:$0xf0]  ;;  %v1964_v55 = vld [vmem:[#allocation2 + $0x80] sm:$0xf]  ;;  %v2024_v19 = vld [vmem:[#allocation2 + $0x130] sm:$0xf] }
  0x13   :  { %364 = vmatpush.bf16.msra.mxu0 %v1953_v25  ;;  %v1933_v56 = vor.u32 %v2219_v54, %v1932_v53  ;;  %v2227_v57 = vld [vmem:[#allocation2 + $0x84] sm:$0xf0]  ;;  %v2238_v20 = vld [vmem:[#allocation2 + $0x134] sm:$0xf0]  ;;  %v2020_v28 = vld [vmem:[#allocation2 + $0x120] sm:$0xf] }
  0x14   :  { %v1965_v58 = vor.u32 %v2227_v57, %v1964_v55  ;;  %v2025_v21 = vor.u32 %v2238_v20, %v2024_v19  ;;  %v2237_v29 = vld [vmem:[#allocation2 + $0x124] sm:$0xf0]  ;;  %v2016_v30 = vld [vmem:[#allocation2 + $0x110] sm:$0xf] }
  0x15   :  { %393 = vmatpush.bf16.msra.mxu1 %v1985_v26  ;;  %v2235_v35 = vld [vmem:[#allocation2 + $0x104] sm:$0xf0] }
  0x16   :  { %473 = vmatpush.bf16.msra.mxu2 %v2025_v21 }
  0x17   :  { %2284 = vset.pattern.permute.xlu1 %v2457_v1  ;;  %365 = vmatpush.bf16.msra.mxu0 %v1949_v32  ;;  %v2236_v32 = vld [vmem:[#allocation2 + $0x114] sm:$0xf0] }
  0x18   :  { %49 = vperm.xlu0 %2281, %v33_v5   ;;  %52 = vperm.xlu1 %2284, %v34_v6  }
  0x19   :  { %2285 = vset.pattern.permute.xlu2 %v2456_v0  ;;  %394 = vmatpush.bf16.msra.mxu1 %v1981_v33  ;;  %v2017_v33 = vor.u32 %v2236_v32, %v2016_v30  ;;  %v2462_v30 = vmov -1e+30  }
  0x1a   :  { %89 = vperm.xlu2 %2285, %v33_v5  }
  0x1b   :  { %366 = vmatpush.bf16.msra.mxu0 %v1945_v38 }
  0x1d   :  { %395 = vmatpush.bf16.msra.mxu1 %v1977_v40 }
  0x1f   :  { %367 = vmatpush.bf16.msra.mxu0 %v1941_v44 }
  0x20   :  { %2286 = vset.pattern.permute.xlu0 %v2456_v0  ;;  %2287 = vset.pattern.permute.xlu1 %v2458_v2 }
  0x21   :  { %92 = vperm.xlu0 %2286, %v34_v6   ;;  %145 = vperm.xlu1 %2287, %v33_v5  }
  0x22   :  { %2288 = vset.pattern.permute.xlu2 %v2458_v2  ;;  %396 = vmatpush.bf16.msra.mxu1 %v1973_v46 }
  0x23   :  { %148 = vperm.xlu2 %2288, %v34_v6   ;;  %368 = vmatpush.bf16.msra.mxu0 %v1937_v50  ;;  %v2459_v6 = vmov 1.0|1.0  }
  0x26   :  { %397 = vmatpush.bf16.msra.mxu1 %v1969_v52 }
  0x27   :  { %369 = vmatpush.bf16.msra.mxu0 %v1933_v56 }
  0x29   :  { %95 = vperm.xlu0 %2286, %v35_v7   ;;  %2289 = vset.pattern.permute.xlu1 %v2457_v1 }
  0x2a   :  { %55 = vperm.xlu1 %2289, %v35_v7   ;;  %398 = vmatpush.bf16.msra.mxu1 %v1965_v58 }
  0x2b   :  { %2290 = vset.pattern.permute.xlu2 %v2457_v1 }
  0x2c   :  { %58 = vperm.xlu2 %2290, %v36_v8  }
  0x31   :  { %2293 = vset.pattern.permute.xlu0 %v2458_v2 }
  0x32   :  { %154 = vperm.xlu0 %2293, %v36_v8   ;;  %2291 = vset.pattern.permute.xlu1 %v2456_v0 }
  0x33   :  { %98 = vperm.xlu1 %2291, %v36_v8  }
  0x34   :  { %2292 = vset.pattern.permute.xlu2 %v2458_v2 }
  0x35   :  { %151 = vperm.xlu2 %2292, %v35_v7  }
  0x3a   :  { %157 = vperm.xlu0 %2293, %v37_v31  }
  0x3b   :  { %2294 = vset.pattern.permute.xlu1 %v2457_v1 }
  0x3c   :  { %61 = vperm.xlu1 %2294, %v37_v31  }
  0x3d   :  { %2295 = vset.pattern.permute.xlu2 %v2457_v1 }
  0x3e   :  { %64 = vperm.xlu2 %2295, %v38_v34  }
  0x44   :  { %2296 = vset.pattern.permute.xlu1 %v2456_v0 }
  0x45   :  { %101 = vperm.xlu1 %2296, %v37_v31   ;;  %v2021_v31 = vor.u32 %v2237_v29, %v2020_v28 }
  0x46   :  { %2297 = vset.pattern.permute.xlu2 %v2456_v0 }
  0x47   :  { %104 = vperm.xlu2 %2297, %v38_v34   ;;  %474 = vmatpush.bf16.msra.mxu2 %v2021_v31 }
  0x4b   :  { %475 = vmatpush.bf16.msra.mxu2 %v2017_v33 }
  0x4d   :  { %2298 = vset.pattern.permute.xlu1 %v2458_v2 }
  0x4e   :  { %160 = vperm.xlu1 %2298, %v38_v34   ;;  %v2012_v34 = vld [vmem:[#allocation2 + $0x100] sm:$0xf] }
  0x4f   :  { %v2013_v36 = vor.u32 %v2235_v35, %v2012_v34 }
  0x51   :  { %476 = vmatpush.bf16.msra.mxu2 %v2013_v36 }
  0x62   :  { %v140_v59 = vpop.permute.xlu2 %139 }
  0x63   :  { %vm162_vm4 = vcmp.eq.s32.totalorder %v2529_v61, %v140_v59  ;;  %vm163_vm6 = vcmp.eq.s32.totalorder %v2532_v63, %v140_v59 }
  0x6a   :  { %v143_v62 = vpop.permute.xlu2 %142 }
  0x6b   :  { %vm164_vm8 = vcmp.eq.s32.totalorder %v2529_v61, %v143_v62 }
  0x74   :  { %v90_v3 = vpop.permute.xlu2 %89 }
  0x79   :  { %v84_v0 = vpop.permute.xlu1 %83 }
  0x7a   :  { %v44_v2 = vpop.permute.xlu0 %43  ;;  %vm106_vm0 = vcmp.eq.s32.totalorder %v2529_v61, %v84_v0  ;;  %vm107_vm2 = vcmp.eq.s32.totalorder %v2532_v63, %v84_v0 }
  0x7b   :  { %vm66_vm1 = vcmp.eq.s32.totalorder %v2529_v61, %v44_v2  ;;  %vm67_vm3 = vcmp.eq.s32.totalorder %v2532_v63, %v44_v2 }
  0x7c   :  { %vm122_vm5 = vmor %vm66_vm1, %vm106_vm0  ;;  %vm165_vm0 = vcmp.eq.s32.totalorder %v2532_v63, %v143_v62 }
  0x7d   :  { %vm123_vm7 = vmor %vm67_vm3, %vm107_vm2  ;;  %v149_v9 = vpop.permute.xlu2 %148 }
  0x7e   :  { %vm178_vm9 = vmor %vm122_vm5, %vm162_vm4 }
  0x7f   :  { %vm179_vm14 = vmor %vm123_vm7, %vm163_vm6  ;;  %vm110_vm6 = vcmp.eq.s32.totalorder %v2529_v61, %v90_v3 }
  0x81   :  { %v87_v4 = vpop.permute.xlu1 %86 }
  0x82   :  { %v47_v5 = vpop.permute.xlu0 %46  ;;  %vm108_vm10 = vcmp.eq.s32.totalorder %v2529_v61, %v87_v4  ;;  %vm109_vm11 = vcmp.eq.s32.totalorder %v2532_v63, %v87_v4 }
  0x83   :  { %vm68_vm12 = vcmp.eq.s32.totalorder %v2529_v61, %v47_v5  ;;  %vm69_vm13 = vcmp.eq.s32.totalorder %v2532_v63, %v47_v5 }
  0x84   :  { %vm124_vm15 = vmor %vm68_vm12, %vm108_vm10  ;;  %vm111_vm10 = vcmp.eq.s32.totalorder %v2532_v63, %v90_v3 }
  0x85   :  { %vm125_vm1 = vmor %vm69_vm13, %vm109_vm11 }
  0x86   :  { %vm180_vm2 = vmor %vm124_vm15, %vm164_vm8  ;;  %v59_v13 = vpop.permute.xlu2 %58 }
  0x87   :  { %vm1994_vm3 = vmpackc.low %vm180_vm2, %vm178_vm9 }
  0x88   :  { %1995 = vmatmul.msk.bf16.vlgmr.msra.gmra.mxu0 %vm1994_vm3, %v2459_v6  ;;  %vm181_vm4 = vmor %vm125_vm1, %vm165_vm0  ;;  %vm168_vm0 = vcmp.eq.s32.totalorder %v2529_v61, %v149_v9 }
  0x89   :  { %vm2002_vm5 = vmpackc.low %vm181_vm4, %vm179_vm14 }
  0x8a   :  { %2003 = vmatmul.msk.bf16.vlgmr.msra.gmra.mxu1 %vm2002_vm5, %v2459_v6  ;;  %v50_v7 = vpop.permute.xlu0 %49  ;;  %v53_v8 = vpop.permute.xlu1 %52 }
  0x8b   :  { %vm70_vm7 = vcmp.eq.s32.totalorder %v2529_v61, %v50_v7  ;;  %vm71_vm11 = vcmp.eq.s32.totalorder %v2532_v63, %v50_v7  ;;  %vm72_vm12 = vcmp.eq.s32.totalorder %v2529_v61, %v53_v8  ;;  %vm73_vm15 = vcmp.eq.s32.totalorder %v2532_v63, %v53_v8 }
  0x8c   :  { %vm126_vm8 = vmor %vm70_vm7, %vm110_vm6  ;;  %vm169_vm6 = vcmp.eq.s32.totalorder %v2532_v63, %v149_v9 }
  0x8d   :  { %vm2552_vm9 = vmor %vm71_vm11, %vm111_vm10 }
  0x8f   :  { %v152_v16 = vpop.permute.xlu2 %151 }
  0x93   :  { %v93_v10 = vpop.permute.xlu0 %92  ;;  %v146_v12 = vpop.permute.xlu1 %145 }
  0x94   :  { %vm112_vm13 = vcmp.eq.s32.totalorder %v2529_v61, %v93_v10  ;;  %vm113_vm14 = vcmp.eq.s32.totalorder %v2532_v63, %v93_v10  ;;  %vm166_vm2 = vcmp.eq.s32.totalorder %v2529_v61, %v146_v12  ;;  %vm167_vm4 = vcmp.eq.s32.totalorder %v2532_v63, %v146_v12 }
  0x95   :  { %vm128_vm1 = vmor %vm72_vm12, %vm112_vm13 }
  0x96   :  { %vm129_vm3 = vmor %vm73_vm15, %vm113_vm14 }
  0x97   :  { %vm182_vm5 = vmor %vm126_vm8, %vm166_vm2  ;;  %vm170_vm2 = vcmp.eq.s32.totalorder %v2529_v61, %v152_v16 }
  0x98   :  { %vm184_vm7 = vmor %vm128_vm1, %vm168_vm0  ;;  %v65_v22 = vpop.permute.xlu2 %64 }
  0x99   :  { %vm1996_vm10 = vmpackc.low %vm184_vm7, %vm182_vm5 }
  0x9a   :  { %1997 = vmatmul.msk.bf16.gmra.mxu0 %vm1996_vm10, %v2459_v6  ;;  %vm183_vm11 = vmor %vm2552_vm9, %vm167_vm4  ;;  %vm171_vm9 = vcmp.eq.s32.totalorder %v2532_v63, %v152_v16  ;;  %vm77_vm4 = vcmp.eq.s32.totalorder %v2532_v63, %v59_v13 }
  0x9b   :  { %vm185_vm12 = vmor %vm129_vm3, %vm169_vm6  ;;  %v96_v14 = vpop.permute.xlu0 %95  ;;  %vm76_vm3 = vcmp.eq.s32.totalorder %v2529_v61, %v59_v13 }
  0x9c   :  { %vm2004_vm13 = vmpackc.low %vm185_vm12, %vm183_vm11  ;;  %v56_v15 = vpop.permute.xlu1 %55  ;;  %vm114_vm15 = vcmp.eq.s32.totalorder %v2529_v61, %v96_v14  ;;  %vm115_vm0 = vcmp.eq.s32.totalorder %v2532_v63, %v96_v14 }
  0x9d   :  { %2005 = vmatmul.msk.bf16.gmra.mxu1 %vm2004_vm13, %v2459_v6  ;;  %vm74_vm14 = vcmp.eq.s32.totalorder %v2529_v61, %v56_v15  ;;  %vm75_vm8 = vcmp.eq.s32.totalorder %v2532_v63, %v56_v15 }
  0x9e   :  { %vm130_vm1 = vmor %vm74_vm14, %vm114_vm15 }
  0x9f   :  { %vm131_vm5 = vmor %vm75_vm8, %vm115_vm0 }
  0xa0   :  { %vm186_vm6 = vmor %vm130_vm1, %vm170_vm2 }
  0xa1   :  { %vm187_vm12 = vmor %vm131_vm5, %vm171_vm9  ;;  %v105_v24 = vpop.permute.xlu2 %104  ;;  %vm80_vm5 = vcmp.eq.s32.totalorder %v2529_v61, %v65_v22 }
  0xa2   :  { %vm120_vm9 = vcmp.eq.s32.totalorder %v2529_v61, %v105_v24 }
  0xa4   :  { %v155_v17 = vpop.permute.xlu0 %154 }
  0xa5   :  { %v99_v18 = vpop.permute.xlu1 %98  ;;  %vm172_vm11 = vcmp.eq.s32.totalorder %v2529_v61, %v155_v17  ;;  %vm173_vm15 = vcmp.eq.s32.totalorder %v2532_v63, %v155_v17 }
  0xa6   :  { %vm116_vm7 = vcmp.eq.s32.totalorder %v2529_v61, %v99_v18  ;;  %vm117_vm10 = vcmp.eq.s32.totalorder %v2532_v63, %v99_v18 }
  0xa7   :  { %vm132_vm13 = vmor %vm76_vm3, %vm116_vm7 }
  0xa8   :  { %vm133_vm14 = vmor %vm77_vm4, %vm117_vm10  ;;  %vm121_vm10 = vcmp.eq.s32.totalorder %v2532_v63, %v105_v24 }
  0xa9   :  { %vm188_vm8 = vmor %vm132_vm13, %vm172_vm11 }
  0xaa   :  { %vm1998_vm0 = vmpackc.low %vm188_vm8, %vm186_vm6  ;;  %vm81_vm6 = vcmp.eq.s32.totalorder %v2532_v63, %v65_v22 }
  0xab   :  { %1999 = vmatmul.msk.bf16.gmra.mxu0 %vm1998_vm0, %v2459_v6  ;;  %vm189_vm1 = vmor %vm133_vm14, %vm173_vm15 }
  0xac   :  { %vm2006_vm2 = vmpackc.low %vm189_vm1, %vm187_vm12  ;;  %v158_v26 = vpop.permute.xlu0 %157 }
  0xad   :  { %2007 = vmatmul.msk.bf16.gmra.mxu1 %vm2006_vm2, %v2459_v6  ;;  %vm136_vm11 = vmor %vm80_vm5, %vm120_vm9  ;;  %vm174_vm15 = vcmp.eq.s32.totalorder %v2529_v61, %v158_v26  ;;  %vm175_vm0 = vcmp.eq.s32.totalorder %v2532_v63, %v158_v26 }
  0xae   :  { %v62_v23 = vpop.permute.xlu1 %61  ;;  %vm137_vm8 = vmor %vm81_vm6, %vm121_vm10  ;;  %vm456_vm6 = vcmask 523264   ;;  %vm514_vm10 = vcmask 261120  }
  0xaf   :  { %vm78_vm7 = vcmp.eq.s32.totalorder %v2529_v61, %v62_v23  ;;  %vm79_vm12 = vcmp.eq.s32.totalorder %v2532_v63, %v62_v23 }
  0xb7   :  { %v102_v25 = vpop.permute.xlu1 %101 }
  0xb8   :  { %vm118_vm3 = vcmp.eq.s32.totalorder %v2529_v61, %v102_v25  ;;  %vm119_vm4 = vcmp.eq.s32.totalorder %v2532_v63, %v102_v25  ;;  %v569_v25 = vshrl.u32 %v39_v60, 7 }
  0xb9   :  { %vm134_vm13 = vmor %vm78_vm7, %vm118_vm3 }
  0xba   :  { %vm135_vm14 = vmor %vm79_vm12, %vm119_vm4  ;;  %v577_v26 = vand.u32 7, %v569_v25  ;;  %v570_v28 = vadd.s32 8, %v569_v25  ;;  %v571_v60 = vadd.s32 16, %v569_v25 }
  0xbb   :  { %vm190_vm1 = vmor %vm134_vm13, %vm174_vm15 }
  0xbc   :  { %vm191_vm9 = vmor %vm135_vm14, %vm175_vm0  ;;  %v578_v33 = vand.u32 7, %v570_v28 }
  0xc0   :  { %v161_v27 = vpop.permute.xlu1 %160 }
  0xc1   :  { %vm176_vm2 = vcmp.eq.s32.totalorder %v2529_v61, %v161_v27  ;;  %vm177_vm5 = vcmp.eq.s32.totalorder %v2532_v63, %v161_v27  ;;  %v2635_v27 = vand.u32 7, %v2529_v61 }
  0xc2   :  { %vm192_vm3 = vmor %vm136_vm11, %vm176_vm2 }
  0xc3   :  { %vm2000_vm7 = vmpackc.low %vm192_vm3, %vm190_vm1  ;;  %vm594_vm11 = vcmp.eq.s32.totalorder %v577_v26, %v2635_v27  ;;  %vm595_vm13 = vcmp.eq.s32.totalorder %v578_v33, %v2635_v27 }
  0xc4   :  { %2001 = vmatmul.msk.bf16.gmra.mxu0 %vm2000_vm7, %v2459_v6  ;;  %vm193_vm4 = vmor %vm137_vm8, %vm177_vm5  ;;  %v602_v31 = vsel %vm594_vm11, 0.0, %v2462_v30  ;;  %v603_v36 = vsel %vm595_vm13, 0.0, %v2462_v30  ;;  %vm982_vm5 = vcmask 654336  }
  0xc5   :  { %vm2008_vm12 = vmpackc.low %vm193_vm4, %vm191_vm9 }
  0xc6   :  { %2009 = vmatmul.msk.bf16.gmra.mxu1 %vm2008_vm12, %v2459_v6 }
 0x105   :  { %v371_v37 = vpop.f32.mrf.mxu0 }
 0x107   :  { %v400_v38 = vpop.f32.mrf.mxu1 }
 0x108   :  { %v401_v41 = vadd.f32 %v400_v38, %v371_v37  ;;  %v579_v38 = vand.u32 7, %v571_v60 }
 0x10a   :  { %vm596_vm14 = vcmp.eq.s32.totalorder %v579_v38, %v2635_v27 }
 0x10d   :  { %v373_v39 = vpop.f32.mrf.mxu0 }
 0x10f   :  { %v402_v40 = vpop.f32.mrf.mxu1 }
 0x110   :  { %v403_v42 = vadd.f32 %v402_v40, %v373_v39 }
 0x112   :  { %v2596_v43 = vpack.c.bf16 %v403_v42, %v401_v41  ;;  %v572_v41 = vadd.s32 24, %v569_v25 }
 0x114   :  { %2026 = vmatmul.msk.bf16.vlgmr.msra.gmra.mxu2 %vm456_vm6, %v2596_v43 }
 0x117   :  { %v376_v44 = vpop.f32.mrf.mxu0 }
 0x11a   :  { %v405_v45 = vpop.f32.mrf.mxu1 }
 0x11b   :  { %v406_v48 = vadd.f32 %v405_v45, %v376_v44  ;;  %v604_v44 = vsel %vm596_vm14, 0.0, %v2462_v30 }
 0x11f   :  { %v378_v46 = vpop.f32.mrf.mxu0 }
 0x122   :  { %v407_v47 = vpop.f32.mrf.mxu1 }
 0x123   :  { %v408_v49 = vadd.f32 %v407_v47, %v378_v46  ;;  %v580_v46 = vand.u32 7, %v572_v41 }
 0x125   :  { %v2600_v50 = vpack.c.bf16 %v408_v49, %v406_v48  ;;  %vm597_vm15 = vcmp.eq.s32.totalorder %v580_v46, %v2635_v27  ;;  %v573_v49 = vadd.s32 32, %v569_v25 }
 0x127   :  { %2027 = vmatmul.msk.bf16.gmra.mxu2 %vm456_vm6, %v2600_v50 }
 0x128   :  { %v381_v51 = vpop.f32.mrf.mxu0 }
 0x12a   :  { %v410_v52 = vpop.f32.mrf.mxu1 }
 0x12b   :  { %v411_v55 = vadd.f32 %v410_v52, %v381_v51  ;;  %v605_v52 = vsel %vm597_vm15, 0.0, %v2462_v30 }
 0x130   :  { %v383_v53 = vpop.f32.mrf.mxu0 }
 0x132   :  { %v412_v54 = vpop.f32.mrf.mxu1 }
 0x133   :  { %v413_v56 = vadd.f32 %v412_v54, %v383_v53  ;;  %v581_v54 = vand.u32 7, %v573_v49 }
 0x135   :  { %v2604_v57 = vpack.c.bf16 %v413_v56, %v411_v55  ;;  %vm598_vm8 = vcmp.eq.s32.totalorder %v581_v54, %v2635_v27 }
 0x137   :  { %2028 = vmatmul.msk.bf16.gmra.mxu2 %vm456_vm6, %v2604_v57 }
 0x141   :  { %v386_v58 = vpop.f32.mrf.mxu0 }
 0x143   :  { %v415_v59 = vpop.f32.mrf.mxu1 }
 0x144   :  { %v416_v0 = vadd.f32 %v415_v59, %v386_v58  ;;  %v574_v58 = vadd.s32 40, %v569_v25 }
 0x149   :  { %v388_v62 = vpop.f32.mrf.mxu0 }
 0x14b   :  { %v417_v63 = vpop.f32.mrf.mxu1 }
 0x14c   :  { %v418_v2 = vadd.f32 %v417_v63, %v388_v62  ;;  %v606_v62 = vsel %vm598_vm8, 0.0, %v2462_v30 }
 0x14e   :  { %v2608_v3 = vpack.c.bf16 %v418_v2, %v416_v0  ;;  %v582_v0 = vand.u32 7, %v574_v58 }
 0x150   :  { %2029 = vmatmul.msk.bf16.gmra.mxu2 %vm456_vm6, %v2608_v3  ;;  %vm599_vm0 = vcmp.eq.s32.totalorder %v582_v0, %v2635_v27 }
 0x197   :  { %v478_v4 = vpop.f32.mrf.mxu2 }
 0x19f   :  { %v480_v5 = vpop.f32.mrf.mxu2 }
 0x1a0   :  { %v2619_v15 = vpack.c.bf16 %v480_v5, %v478_v4  ;;  %v575_v5 = vadd.s32 48, %v569_v25 }
 0x1aa   :  { %v483_v6 = vpop.f32.mrf.mxu2 }
 0x1b2   :  { %v485_v7 = vpop.f32.mrf.mxu2 }
 0x1b3   :  { %v2612_v8 = vpack.c.bf16 %v485_v7, %v483_v6  ;;  %v607_v7 = vsel %vm599_vm0, 0.0, %v2462_v30 }
 0x1b5   :  { %508 = vrot.lane.b32.xlu1 %v2612_v8, %s2460_s0 }
 0x1ba   :  { %v488_v9 = vpop.f32.mrf.mxu2 }
 0x1c2   :  { %v490_v10 = vpop.f32.mrf.mxu2 }
 0x1c3   :  { %v2615_v11 = vpack.c.bf16 %v490_v10, %v488_v9  ;;  %v583_v10 = vand.u32 7, %v575_v5 }
 0x1c5   :  { %510 = vrot.lane.b32.xlu0 %v2615_v11, %s2460_s0  ;;  %vm600_vm1 = vcmp.eq.s32.totalorder %v583_v10, %v2635_v27 }
 0x1d3   :  { %v493_v12 = vpop.f32.mrf.mxu2 }
 0x1db   :  { %v495_v13 = vpop.f32.mrf.mxu2 }
 0x1dc   :  { %v501_v14 = vpack.c.bf16 %v495_v13, %v493_v12 }
 0x1de   :  { %716 = vrot.lane.b32.xlu1 %v501_v14, %s2461_s7  ;;  %512 = vrot.lane.b32.xlu2 %v501_v14, %s2460_s0 }
 0x1e6   :  { %506 = vrot.lane.b32.xlu2 %v2619_v15, %s2460_s0 }
 0x227   :  { %v509_v20 = vpop.permute.xlu1 %508 }
 0x228   :  { %v531_v21 = vsel %vm514_vm10, %v509_v20, 0 }
 0x237   :  { %v511_v18 = vpop.permute.xlu0 %510 }
 0x238   :  { %v513_v16 = vpop.permute.xlu2 %512  ;;  %v534_v19 = vsel %vm514_vm10, %v511_v18, 0 }
 0x239   :  { %v537_v17 = vsel %vm514_vm10, %v513_v16, 0 }
 0x23a   :  { %543 = vmatpush.bf16.xpose.msra.mxu3 %v537_v17  ;;  %v608_v17 = vsel %vm600_vm1, 0.0, %v2462_v30 }
 0x240   :  { %v507_v22 = vpop.permute.xlu2 %506 }
 0x241   :  { %v528_v24 = vsel %vm514_vm10, %v507_v22, 0 }
 0x242   :  { %544 = vmatpush.bf16.xpose.msra.mxu3 %v534_v19 }
 0x24a   :  { %545 = vmatpush.bf16.xpose.msra.mxu3 %v531_v21 }
 0x250   :  { %v717_v23 = vpop.permute.xlu1 %716 }
 0x251   :  { %738 = vmatpush.bf16.msrb.mxu2 %v717_v23 }
 0x252   :  { %546 = vmatpush.bf16.xpose.msra.mxu3 %v528_v24 }
 0x259   :  { %2030 = vmatmul.msk.bf16.vlgmr.msra.gmra.mxu3 %vm514_vm10, %v2619_v15 }
 0x269   :  { %2031 = vmatmul.msk.bf16.gmra.mxu3 %vm514_vm10, %v2612_v8 }
 0x279   :  { %2032 = vmatmul.msk.bf16.gmra.mxu3 %vm514_vm10, %v2615_v11 }
 0x289   :  { %2033 = vmatmul.msk.bf16.gmra.mxu3 %vm514_vm10, %v501_v14  ;;  %v576_v14 = vadd.s32 56, %v569_v25 }
 0x28b   :  { %v584_v19 = vand.u32 7, %v576_v14 }
 0x28d   :  { %vm601_vm2 = vcmp.eq.s32.totalorder %v584_v19, %v2635_v27  ;;  %v2108_v19 = vld [vmem:[#allocation2 + $0x1a0] sm:$0xf] }
 0x28e   :  { %v609_v23 = vsel %vm601_vm2, 0.0, %v2462_v30 }
 0x2dc   :  { %v548_v29 = vpop.f32.mrf.mxu3 }
 0x2dd   :  { %v586_v32 = vmul.f32 0.17677669, %v548_v29 }
 0x2df   :  { %v2639_v34 = vadd.f32 %v602_v31, %v586_v32 }
 0x2e1   :  { %v618_v35 = vsel %vm456_vm6, %v2639_v34, -inf }
 0x2e2   :  { %619 = vmax.xlane.f32.xlu0 %v618_v35 }
 0x2e4   :  { %v550_v61 = vpop.f32.mrf.mxu3 }
 0x2e5   :  { %v587_v37 = vmul.f32 0.17677669, %v550_v61 }
 0x2e7   :  { %v2645_v39 = vadd.f32 %v603_v36, %v587_v37 }
 0x2e9   :  { %v621_v40 = vsel %vm456_vm6, %v2645_v39, -inf }
 0x2ea   :  { %622 = vmax.xlane.f32.xlu1 %v621_v40 }
 0x2ec   :  { %v553_v42 = vpop.f32.mrf.mxu3 }
 0x2ed   :  { %v588_v45 = vmul.f32 0.17677669, %v553_v42 }
 0x2ef   :  { %v612_v47 = vadd.f32 %v604_v44, %v588_v45 }
 0x2f1   :  { %v624_v48 = vsel %vm456_vm6, %v612_v47, -inf }
 0x2f2   :  { %625 = vmax.xlane.f32.xlu2 %v624_v48 }
 0x2f4   :  { %v555_v51 = vpop.f32.mrf.mxu3 }
 0x2f5   :  { %v589_v53 = vmul.f32 0.17677669, %v555_v51 }
 0x2f7   :  { %v2654_v55 = vadd.f32 %v605_v52, %v589_v53 }
 0x2f9   :  { %v627_v56 = vsel %vm456_vm6, %v2654_v55, -inf }
 0x2fa   :  { %628 = vmax.xlane.f32.xlu2 %v627_v56 }
 0x2fc   :  { %v558_v59 = vpop.f32.mrf.mxu3 }
 0x2fd   :  { %v590_v63 = vmul.f32 0.17677669, %v558_v59 }
 0x2ff   :  { %v614_v2 = vadd.f32 %v606_v62, %v590_v63 }
 0x301   :  { %v630_v4 = vsel %vm456_vm6, %v614_v2, -inf }
 0x302   :  { %631 = vmax.xlane.f32.xlu0 %v630_v4 }
 0x304   :  { %v560_v6 = vpop.f32.mrf.mxu3 }
 0x305   :  { %v591_v9 = vmul.f32 0.17677669, %v560_v6 }
 0x307   :  { %v615_v12 = vadd.f32 %v607_v7, %v591_v9 }
 0x309   :  { %v633_v13 = vsel %vm456_vm6, %v615_v12, -inf }
 0x30a   :  { %634 = vmax.xlane.f32.xlu1 %v633_v13 }
 0x30c   :  { %v563_v16 = vpop.f32.mrf.mxu3 }
 0x30d   :  { %v592_v18 = vmul.f32 0.17677669, %v563_v16 }
 0x30f   :  { %v616_v20 = vadd.f32 %v608_v17, %v592_v18 }
 0x311   :  { %v636_v21 = vsel %vm456_vm6, %v616_v20, -inf }
 0x312   :  { %637 = vmax.xlane.f32.xlu2 %v636_v21 }
 0x314   :  { %v565_v22 = vpop.f32.mrf.mxu3 }
 0x315   :  { %v593_v24 = vmul.f32 0.17677669, %v565_v22 }
 0x317   :  { %v617_v26 = vadd.f32 %v609_v23, %v593_v24 }
 0x319   :  { %v639_v28 = vsel %vm456_vm6, %v617_v26, -inf }
 0x31a   :  { %640 = vmax.xlane.f32.xlu0 %v639_v28 }
 0x323   :  { %710 = vrot.lane.b32.xlu1 %v2619_v15, %s2461_s7 }
 0x355   :  { %v620_v25 = vpop.xlane.xlu0 %619 }
 0x356   :  { %v642_v29 = vsub.f32 %v2639_v34, %v620_v25 }
 0x358   :  { %v650_v31 = vmul.f32 1.442695, %v642_v29 }
 0x35a   :  { %2299 = vpow2.f32 %v650_v31 }
 0x35d   :  { %v623_v32 = vpop.xlane.xlu1 %622 }
 0x35e   :  { %v643_v27 = vsub.f32 %v2645_v39, %v623_v32  ;;  %v2100_v32 = vld [vmem:[#allocation2 + $0x190] sm:$0xf] }
 0x360   :  { %v2674_v33 = vpop.eup %2299  ;;  %v652_v35 = vmul.f32 1.442695, %v643_v27  ;;  %v2248_v27 = vld [vmem:[#allocation2 + $0x194] sm:$0xf0] }
 0x361   :  { %v666_v30 = vsel %vm456_vm6, %v2674_v33, 0.0 }
 0x362   :  { %2301 = vpow2.f32 %v652_v35  ;;  %667 = vadd.xlane.f32.xlu2 %v666_v30  ;;  %v2101_v35 = vor.u32 %v2248_v27, %v2100_v32  ;;  %v2246_v30 = vld [vmem:[#allocation2 + $0x184] sm:$0xf0]  ;;  %v2060_v27 = vld [vmem:[#allocation2 + $0x1c0] sm:$0xf] }
 0x365   :  { %v626_v60 = vpop.xlane.xlu2 %625 }
 0x366   :  { %v644_v61 = vsub.f32 %v612_v47, %v626_v60 }
 0x368   :  { %v2302_v36 = vpop.eup %2301  ;;  %v654_v15 = vmul.f32 1.442695, %v644_v61  ;;  %v2084_v61 = vld [vmem:[#allocation2 + $0x170] sm:$0xf] }
 0x369   :  { %v669_v37 = vsel %vm456_vm6, %v2302_v36, 0.0 }
 0x36a   :  { %2303 = vpow2.f32 %v654_v15  ;;  %670 = vadd.xlane.f32.xlu0 %v669_v37 }
 0x36d   :  { %v629_v47 = vpop.xlane.xlu2 %628 }
 0x36e   :  { %v645_v49 = vsub.f32 %v2654_v55, %v629_v47 }
 0x370   :  { %v2679_v34 = vpop.eup %2303  ;;  %v656_v52 = vmul.f32 1.442695, %v645_v49  ;;  %v2240_v49 = vld [vmem:[#allocation2 + $0x154] sm:$0xf0] }
 0x371   :  { %v672_v38 = vsel %vm456_vm6, %v2679_v34, 0.0 }
 0x372   :  { %673 = vadd.xlane.f32.xlu1 %v672_v38  ;;  %v2242_v38 = vld [vmem:[#allocation2 + $0x164] sm:$0xf0] }
 0x375   :  { %v632_v45 = vpop.xlane.xlu0 %631 }
 0x376   :  { %v646_v46 = vsub.f32 %v614_v2, %v632_v45 }
 0x378   :  { %v658_v48 = vmul.f32 1.442695, %v646_v46 }
 0x37a   :  { %714 = vrot.lane.b32.xlu2 %v2615_v11, %s2461_s7 }
 0x37d   :  { %v635_v39 = vpop.xlane.xlu1 %634 }
 0x37e   :  { %v647_v40 = vsub.f32 %v615_v12, %v635_v39  ;;  %712 = vrot.lane.b32.xlu0 %v2612_v8, %s2461_s7 }
 0x380   :  { %v660_v41 = vmul.f32 1.442695, %v647_v40 }
 0x382   :  { %2305 = vpow2.f32 %v660_v41 }
 0x383   :  { %2307 = vpow2.f32 %v658_v48  ;;  %v2044_v48 = vld [vmem:[#allocation2 + $0x150] sm:$0xf] }
 0x384   :  { %2309 = vpow2.f32 %v656_v52 }
 0x385   :  { %v638_v53 = vpop.xlane.xlu2 %637 }
 0x386   :  { %v648_v54 = vsub.f32 %v616_v20, %v638_v53  ;;  %v2250_v20 = vld [vmem:[#allocation2 + $0x1a4] sm:$0xf0] }
 0x387   :  { %v2109_v21 = vor.u32 %v2250_v20, %v2108_v19 }
 0x388   :  { %v2687_v42 = vpop.eup %2305  ;;  %v662_v58 = vmul.f32 1.442695, %v648_v54 }
 0x389   :  { %v681_v44 = vsel %vm456_vm6, %v2687_v42, 0.0  ;;  %v2692_v56 = vpop.eup %2307 }
 0x38a   :  { %682 = vadd.xlane.f32.xlu1 %v681_v44  ;;  %v678_v59 = vsel %vm456_vm6, %v2692_v56, 0.0  ;;  %v2310_v62 = vpop.eup %2309 }
 0x38b   :  { %v675_v55 = vsel %vm456_vm6, %v2310_v62, 0.0 }
 0x38d   :  { %v641_v11 = vpop.xlane.xlu0 %640 }
 0x38e   :  { %v649_v51 = vsub.f32 %v617_v26, %v641_v11  ;;  %v2045_v11 = vor.u32 %v2240_v49, %v2044_v48 }
 0x390   :  { %v664_v8 = vmul.f32 1.442695, %v649_v51  ;;  %801 = vmatpush.bf16.msrb.mxu0 %v2045_v11  ;;  %v2255_v11 = vld [vmem:[#allocation2 + $0x1d4] sm:$0xf] }
 0x392   :  { %2311 = vpow2.f32 %v664_v8 }
 0x393   :  { %2313 = vpow2.f32 %v662_v58 }
 0x395   :  { %v711_v14 = vpop.permute.xlu1 %710 }
 0x398   :  { %v2696_v63 = vpop.eup %2311 }
 0x399   :  { %v687_v0 = vsel %vm456_vm6, %v2696_v63, 0.0  ;;  %v2701_v2 = vpop.eup %2313 }
 0x39a   :  { %v684_v4 = vsel %vm456_vm6, %v2701_v2, 0.0 }
 0x3a3   :  { %679 = vadd.xlane.f32.xlu2 %v678_v59 }
 0x3a8   :  { %676 = vadd.xlane.f32.xlu0 %v675_v55 }
 0x3ab   :  { %688 = vadd.xlane.f32.xlu2 %v687_v0 }
 0x3b0   :  { %685 = vadd.xlane.f32.xlu0 %v684_v4  ;;  %v2110_v4 = vld [vmem:[#allocation2 + $0x1a8] sm:$0xf0] }
 0x3d5   :  { %v668_v5 = vpop.xlane.xlu2 %667 }
 0x3dd   :  { %v715_v6 = vpop.permute.xlu2 %714  ;;  %v671_v7 = vpop.xlane.xlu0 %670 }
 0x3de   :  { %739 = vmatpush.bf16.msrb.mxu2 %v715_v6  ;;  %2315 = vrcp.f32 %v671_v7  ;;  %v2247_v7 = vld [vmem:[#allocation2 + $0x194] sm:$0xf] }
 0x3df   :  { %2317 = vrcp.f32 %v668_v5 }
 0x3e4   :  { %v2316_v9 = vpop.eup %2315 }
 0x3e5   :  { %v2318_v12 = vpop.eup %2317  ;;  %v699_v13 = vmul.f32 %v2316_v9, %v2302_v36  ;;  %v674_v18 = vpop.xlane.xlu1 %673  ;;  %v2244_v36 = vld [vmem:[#allocation2 + $0x174] sm:$0xf0]  ;;  %v2102_v9 = vld [vmem:[#allocation2 + $0x198] sm:$0xf0] }
 0x3e6   :  { %v698_v16 = vmul.f32 %v2318_v12, %v2674_v33  ;;  %2319 = vrcp.f32 %v674_v18  ;;  %v2092_v33 = vld [vmem:[#allocation2 + $0x180] sm:$0xf]  ;;  %v2085_v37 = vor.u32 %v2244_v36, %v2084_v61  ;;  %v2086_v18 = vld [vmem:[#allocation2 + $0x178] sm:$0xf0]  ;;  %v2251_v61 = vld [vmem:[#allocation2 + $0x1b4] sm:$0xf] }
 0x3e7   :  { %v2093_v60 = vor.u32 %v2246_v30, %v2092_v33  ;;  %v2254_v33 = vld [vmem:[#allocation2 + $0x1c4] sm:$0xf0]  ;;  %v2052_v30 = vld [vmem:[#allocation2 + $0x1b0] sm:$0xf] }
 0x3e8   :  { %v706_v17 = vpack.c.bf16 %v699_v13, %v698_v16  ;;  %v2245_v13 = vld [vmem:[#allocation2 + $0x184] sm:$0xf] }
 0x3ec   :  { %v2320_v23 = vpop.eup %2319 }
 0x3ed   :  { %v700_v26 = vmul.f32 %v2320_v23, %v2679_v34  ;;  %v2076_v34 = vld [vmem:[#allocation2 + $0x160] sm:$0xf] }
 0x3ee   :  { %v2077_v41 = vor.u32 %v2242_v38, %v2076_v34  ;;  %v2261_v34 = vld [vmem:[#allocation2 + $0x204] sm:$0xf]  ;;  %v2150_v38 = vld [vmem:[#allocation2 + $0x208] sm:$0xf0] }
 0x3f0   :  { %v713_v10 = vpop.permute.xlu0 %712 }
 0x3f1   :  { %740 = vmatpush.bf16.msrb.mxu2 %v713_v10  ;;  %v2105_v10 = vor.u32 %v2247_v7, %v2102_v9 }
 0x3f5   :  { %741 = vmatpush.bf16.msrb.mxu2 %v711_v14  ;;  %v2094_v14 = vld [vmem:[#allocation2 + $0x188] sm:$0xf0] }
 0x3f6   :  { %v2097_v16 = vor.u32 %v2245_v13, %v2094_v14 }
 0x3f8   :  { %2034 = vmatmul.msk.bf16.vlgmr.msrb.gmra.mxu2 %vm456_vm6, %v706_v17  ;;  %v2243_v17 = vld [vmem:[#allocation2 + $0x174] sm:$0xf] }
 0x3f9   :  { %994 = vmatpush.bf16.msra.mxu2 %v2109_v21  ;;  %v2089_v19 = vor.u32 %v2243_v17, %v2086_v18  ;;  %v2241_v21 = vld [vmem:[#allocation2 + $0x164] sm:$0xf] }
 0x3fd   :  { %v683_v31 = vpop.xlane.xlu1 %682  ;;  %995 = vmatpush.bf16.msra.mxu2 %v2101_v35  ;;  %v2061_v35 = vor.u32 %v2254_v33, %v2060_v27 }
 0x3ff   :  { %880 = vmatpush.bf16.msrb.mxu1 %v2061_v35 }
 0x401   :  { %996 = vmatpush.bf16.msra.mxu2 %v2093_v60  ;;  %v2252_v60 = vld [vmem:[#allocation2 + $0x1b4] sm:$0xf0] }
 0x402   :  { %v2053_v36 = vor.u32 %v2252_v60, %v2052_v30 }
 0x404   :  { %881 = vmatpush.bf16.msrb.mxu1 %v2053_v36 }
 0x405   :  { %997 = vmatpush.bf16.msra.mxu2 %v2085_v37 }
 0x409   :  { %998 = vmatpush.bf16.msra.mxu2 %v2077_v41 }
 0x416   :  { %v680_v25 = vpop.xlane.xlu2 %679 }
 0x41b   :  { %v677_v22 = vpop.xlane.xlu0 %676 }
 0x41c   :  { %2321 = vrcp.f32 %v677_v22  ;;  %v2078_v22 = vld [vmem:[#allocation2 + $0x168] sm:$0xf0] }
 0x41d   :  { %2323 = vrcp.f32 %v680_v25  ;;  %v2062_v25 = vld [vmem:[#allocation2 + $0x1c8] sm:$0xf0] }
 0x41e   :  { %2325 = vrcp.f32 %v683_v31  ;;  %v689_v47 = vpop.xlane.xlu2 %688 }
 0x422   :  { %v2322_v24 = vpop.eup %2321 }
 0x423   :  { %v701_v28 = vmul.f32 %v2322_v24, %v2310_v62  ;;  %v2324_v15 = vpop.eup %2323  ;;  %v686_v45 = vpop.xlane.xlu0 %685  ;;  %v2081_v24 = vor.u32 %v2241_v21, %v2078_v22 }
 0x424   :  { %v2326_v39 = vpop.eup %2325  ;;  %v702_v40 = vmul.f32 %v2324_v15, %v2692_v56  ;;  %2327 = vrcp.f32 %v686_v45  ;;  %v2239_v56 = vld [vmem:[#allocation2 + $0x144] sm:$0xf0]  ;;  %v2054_v15 = vld [vmem:[#allocation2 + $0x1b8] sm:$0xf0] }
 0x425   :  { %v707_v29 = vpack.c.bf16 %v701_v28, %v700_v26  ;;  %v703_v44 = vmul.f32 %v2326_v39, %v2687_v42  ;;  %2329 = vrcp.f32 %v689_v47  ;;  %v2040_v42 = vld [vmem:[#allocation2 + $0x140] sm:$0xf]  ;;  %v2253_v28 = vld [vmem:[#allocation2 + $0x1c4] sm:$0xf]  ;;  %v2057_v37 = vor.u32 %v2251_v61, %v2054_v15 }
 0x426   :  { %v2041_v58 = vor.u32 %v2239_v56, %v2040_v42  ;;  %v2731_v39 = vor.u32 %v2261_v34, %v2150_v38  ;;  %v2140_v56 = vld [vmem:[#allocation2 + $0x1f0] sm:$0xf] }
 0x427   :  { %2035 = vmatmul.msk.bf16.gmra.mxu2 %vm456_vm6, %v707_v29  ;;  %v708_v46 = vpack.c.bf16 %v703_v44, %v702_v40  ;;  %v2065_v29 = vor.u32 %v2253_v28, %v2062_v25  ;;  %v2142_v44 = vld [vmem:[#allocation2 + $0x1f8] sm:$0xf0]  ;;  %v1049_v25 = vld [vmem:[%s2990_s2] ss:$2 sm:$0x3] }
 0x428   :  { %802 = vmatpush.bf16.msrb.mxu0 %v2041_v58  ;;  %1403 = vmatpush.bf16.msrb.mxu2 %v2731_v39  ;;  %v2260_v58 = vld [vmem:[#allocation2 + $0x1f4] sm:$0xf0]  ;;  %v2835_v36 = vperm.slane %v1049_v25, 1 }
 0x429   :  { %909 = vmatpush.bf16.msrb.mxu3 %v2065_v29 }
 0x42a   :  { %v2328_v51 = vpop.eup %2327 }
 0x42b   :  { %v2330_v52 = vpop.eup %2329  ;;  %v704_v53 = vmul.f32 %v2328_v51, %v2701_v2  ;;  %v2249_v2 = vld [vmem:[#allocation2 + $0x1a4] sm:$0xf]  ;;  %v2126_v51 = vld [vmem:[#allocation2 + $0x1d8] sm:$0xf0] }
 0x42c   :  { %v705_v8 = vmul.f32 %v2330_v52, %v2696_v63  ;;  %v2113_v6 = vor.u32 %v2249_v2, %v2110_v4  ;;  %v2148_v52 = vld [vmem:[#allocation2 + $0x200] sm:$0xf]  ;;  %v2124_v2 = vld [vmem:[#allocation2 + $0x1d0] sm:$0xf]  ;;  %v2256_v4 = vld [vmem:[#allocation2 + $0x1d4] sm:$0xf0] }
 0x42d   :  { %910 = vmatpush.bf16.msrb.mxu3 %v2057_v37 }
 0x42e   :  { %v709_v54 = vpack.c.bf16 %v705_v8, %v704_v53  ;;  %1023 = vmatpush.bf16.msra.mxu0 %v2113_v6  ;;  %v2754_v53 = vor.u32 %v2255_v11, %v2126_v51  ;;  %v2262_v8 = vld [vmem:[#allocation2 + $0x204] sm:$0xf0]  ;;  %v2776_v6 = vor.u32 %v2256_v4, %v2124_v2 }
 0x431   :  { %1139 = vmatpush.bf16.msra.mxu3 %v2731_v39 }
 0x432   :  { %1024 = vmatpush.bf16.msra.mxu0 %v2105_v10 }
 0x436   :  { %1025 = vmatpush.bf16.msra.mxu0 %v2097_v16 }
 0x437   :  { %2036 = vmatmul.msk.bf16.gmra.mxu2 %vm456_vm6, %v708_v46  ;;  %v2134_v46 = vld [vmem:[#allocation2 + $0x1e8] sm:$0xf0] }
 0x43a   :  { %1026 = vmatpush.bf16.msra.mxu0 %v2089_v19 }
 0x43e   :  { %1027 = vmatpush.bf16.msra.mxu0 %v2081_v24 }
 0x447   :  { %2037 = vmatmul.msk.bf16.gmra.mxu2 %vm456_vm6, %v709_v54  ;;  %v2756_v54 = vor.u32 %v2262_v8, %v2148_v52 }
 0x449   :  { %1126 = vmatpush.bf16.msra.mxu1 %v2756_v54 }
 0x457   :  { %2114 = vmatmul.msk.bf16.vlgmr.msra.gmra.mxu2 %vm982_vm5, %v2596_v43 }
 0x467   :  { %2115 = vmatmul.msk.bf16.gmra.mxu2 %vm982_vm5, %v2600_v50 }
 0x477   :  { %2116 = vmatmul.msk.bf16.gmra.mxu2 %vm982_vm5, %v2604_v57 }
 0x47b   :  { %v743_v59 = vpop.f32.mrf.mxu2 }
 0x483   :  { %v745_v62 = vpop.f32.mrf.mxu2 }
 0x484   :  { %v763_v63 = vpack.c.bf16 %v745_v62, %v743_v59  ;;  %v2132_v59 = vld [vmem:[#allocation2 + $0x1e0] sm:$0xf]  ;;  %v2764_v62 = vor.u32 %v2260_v58, %v2140_v56 }
 0x486   :  { %2046 = vmatmul.msk.bf16.vlgmr.msrb.gmra.mxu0 %vm514_vm10, %v763_v63  ;;  %v2258_v63 = vld [vmem:[#allocation2 + $0x1e4] sm:$0xf0]  ;;  %1127 = vmatpush.bf16.msra.mxu1 %v2764_v62 }
 0x487   :  { %2117 = vmatmul.msk.bf16.gmra.mxu2 %vm982_vm5, %v2608_v3  ;;  %1491 = vmatpush.bf16.msrb.mxu0 %v2731_v39 }
 0x4aa   :  { %v748_v55 = vpop.f32.mrf.mxu2 }
 0x4b2   :  { %v750_v0 = vpop.f32.mrf.mxu2 }
 0x4b3   :  { %v764_v5 = vpack.c.bf16 %v750_v0, %v748_v55  ;;  %v2768_v55 = vor.u32 %v2258_v63, %v2132_v59 }
 0x4b5   :  { %2047 = vmatmul.msk.bf16.gmra.mxu0 %vm514_vm10, %v764_v5  ;;  %1128 = vmatpush.bf16.msra.mxu1 %v2768_v55 }
 0x4b9   :  { %1129 = vmatpush.bf16.msra.mxu1 %v2776_v6 }
 0x4ba   :  { %v753_v12 = vpop.f32.mrf.mxu2 }
 0x4c2   :  { %v755_v20 = vpop.f32.mrf.mxu2 }
 0x4c3   :  { %v765_v23 = vpack.c.bf16 %v755_v20, %v753_v12 }
 0x4c5   :  { %2048 = vmatmul.msk.bf16.gmra.mxu0 %vm514_vm10, %v765_v23 }
 0x4ca   :  { %v758_v26 = vpop.f32.mrf.mxu2 }
 0x4d2   :  { %v760_v31 = vpop.f32.mrf.mxu2 }
 0x4d3   :  { %v766_v32 = vpack.c.bf16 %v760_v31, %v758_v26 }
 0x4d5   :  { %2049 = vmatmul.msk.bf16.gmra.mxu0 %vm514_vm10, %v766_v32  ;;  %v2830_v32 = vperm.slane %v1049_v25, 0 }
 0x4da   :  { %v1000_v29 = vpop.f32.mrf.mxu2 }
 0x4e5   :  { %2118 = vmatmul.msk.bf16.vlgmr.msra.gmra.mxu0 %vm982_vm5, %v2596_v43 }
 0x4f5   :  { %2119 = vmatmul.msk.bf16.gmra.mxu0 %vm982_vm5, %v2600_v50  ;;  %v2259_v50 = vld [vmem:[#allocation2 + $0x1f4] sm:$0xf] }
 0x4f6   :  { %v2742_v45 = vor.u32 %v2259_v50, %v2142_v44 }
 0x4f8   :  { %1140 = vmatpush.bf16.msra.mxu3 %v2742_v45  ;;  %1404 = vmatpush.bf16.msrb.mxu2 %v2742_v45 }
 0x4f9   :  { %1492 = vmatpush.bf16.msrb.mxu0 %v2742_v45 }
 0x503   :  { %v804_v43 = vpop.f32.mrf.mxu0 }
 0x505   :  { %2120 = vmatmul.msk.bf16.gmra.mxu0 %vm982_vm5, %v2604_v57  ;;  %v2257_v57 = vld [vmem:[#allocation2 + $0x1e4] sm:$0xf] }
 0x506   :  { %v2747_v47 = vor.u32 %v2257_v57, %v2134_v46 }
 0x508   :  { %1141 = vmatpush.bf16.msra.mxu3 %v2747_v47  ;;  %1405 = vmatpush.bf16.msrb.mxu2 %v2747_v47 }
 0x509   :  { %1493 = vmatpush.bf16.msrb.mxu0 %v2747_v47 }
 0x50b   :  { %v806_v40 = vpop.f32.mrf.mxu0 }
 0x50c   :  { %v834_v41 = vpack.c.bf16 %v806_v40, %v804_v43  ;;  %1142 = vmatpush.bf16.msra.mxu3 %v2754_v53  ;;  %1406 = vmatpush.bf16.msrb.mxu2 %v2754_v53 }
 0x50d   :  { %1494 = vmatpush.bf16.msrb.mxu0 %v2754_v53 }
 0x50e   :  { %2066 = vmatmul.msk.bf16.vlgmr.msrb.gmra.mxu1 %vm514_vm10, %v834_v41  ;;  %2070 = vmatmul.msk.bf16.vlgmr.msrb.gmra.mxu3 %vm514_vm10, %v834_v41 }
 0x50f   :  { %1214 = vmatpush.bf16.msrb.mxu1 %v2756_v54 }
 0x510   :  { %1227 = vmatpush.bf16.msrb.mxu3 %v2731_v39  ;;  %1579 = vmatpush.bf16.msra.mxu2 %v2731_v39 }
 0x511   :  { %1667 = vmatpush.bf16.msra.mxu0 %v2731_v39 }
 0x513   :  { %1215 = vmatpush.bf16.msrb.mxu1 %v2764_v62 }
 0x514   :  { %1228 = vmatpush.bf16.msrb.mxu3 %v2742_v45  ;;  %1580 = vmatpush.bf16.msra.mxu2 %v2742_v45 }
 0x515   :  { %2121 = vmatmul.msk.bf16.gmra.mxu0 %vm982_vm5, %v2608_v3 }
 0x516   :  { %1668 = vmatpush.bf16.msra.mxu0 %v2742_v45 }
 0x517   :  { %1216 = vmatpush.bf16.msrb.mxu1 %v2768_v55 }
 0x518   :  { %1229 = vmatpush.bf16.msrb.mxu3 %v2747_v47  ;;  %1581 = vmatpush.bf16.msra.mxu2 %v2747_v47 }
 0x51a   :  { %1669 = vmatpush.bf16.msra.mxu0 %v2747_v47 }
 0x51b   :  { %1217 = vmatpush.bf16.msrb.mxu1 %v2776_v6 }
 0x51c   :  { %1230 = vmatpush.bf16.msrb.mxu3 %v2754_v53  ;;  %1582 = vmatpush.bf16.msra.mxu2 %v2754_v53 }
 0x51e   :  { %1670 = vmatpush.bf16.msra.mxu0 %v2754_v53 }
 0x532   :  { %v809_v3 = vpop.f32.mrf.mxu0 }
 0x53a   :  { %v811_v48 = vpop.f32.mrf.mxu0 }
 0x53b   :  { %v835_v49 = vpack.c.bf16 %v811_v48, %v809_v3 }
 0x53d   :  { %2067 = vmatmul.msk.bf16.gmra.mxu1 %vm514_vm10, %v835_v49  ;;  %2071 = vmatmul.msk.bf16.gmra.mxu3 %vm514_vm10, %v835_v49 }
 0x542   :  { %v814_v42 = vpop.f32.mrf.mxu0 }
 0x54a   :  { %v816_v0 = vpop.f32.mrf.mxu0 }
 0x54b   :  { %v836_v5 = vpack.c.bf16 %v816_v0, %v814_v42 }
 0x54d   :  { %2068 = vmatmul.msk.bf16.gmra.mxu1 %vm514_vm10, %v836_v5  ;;  %2072 = vmatmul.msk.bf16.gmra.mxu3 %vm514_vm10, %v836_v5 }
 0x552   :  { %v819_v7 = vpop.f32.mrf.mxu0 }
 0x55a   :  { %v821_v9 = vpop.f32.mrf.mxu0 }
 0x55b   :  { %v837_v10 = vpack.c.bf16 %v821_v9, %v819_v7 }
 0x55d   :  { %2069 = vmatmul.msk.bf16.gmra.mxu1 %vm514_vm10, %v837_v10  ;;  %2073 = vmatmul.msk.bf16.gmra.mxu3 %vm514_vm10, %v837_v10 }
 0x562   :  { %v1029_v35 = vpop.f32.mrf.mxu0 }
 0x56d   :  { %1130 = vmatmul.bf16.vlgmr.msra.gmra.mxu1 %v2457_v1  ;;  %1143 = vmatmul.bf16.vlgmr.msra.gmra.mxu3 %v2457_v1 }
 0x56e   :  { %1315 = vmatpush.bf16.msra.mxu3 %v2731_v39  ;;  %1302 = vmatpush.bf16.msra.mxu1 %v2756_v54 }
 0x572   :  { %1316 = vmatpush.bf16.msra.mxu3 %v2742_v45  ;;  %1303 = vmatpush.bf16.msra.mxu1 %v2764_v62 }
 0x576   :  { %1317 = vmatpush.bf16.msra.mxu3 %v2747_v47  ;;  %1304 = vmatpush.bf16.msra.mxu1 %v2768_v55 }
 0x57a   :  { %1318 = vmatpush.bf16.msra.mxu3 %v2754_v53  ;;  %1305 = vmatpush.bf16.msra.mxu1 %v2776_v6 }
 0x58b   :  { %v883_v12 = vpop.f32.mrf.mxu1 }
 0x58c   :  { %v1001_v31 = vadd.f32 %v1000_v29, %v883_v12 }
 0x58e   :  { %v1055_v33 = vadd.f32 %v2830_v32, %v1001_v31 }
 0x591   :  { %v912_v13 = vpop.f32.mrf.mxu3 }
 0x592   :  { %v1030_v60 = vadd.f32 %v1029_v35, %v912_v13 }
 0x593   :  { %v2801_v14 = vpop.f32.mrf.mxu1 }
 0x594   :  { %v1056_v15 = vadd.f32 %v2835_v36, %v1030_v60 }
 0x599   :  { %v2803_v1 = vpop.f32.mrf.mxu3 }
 0x5ba   :  { %v2805_v16 = vpop.f32.mrf.mxu1 }
 0x5c0   :  { %v2807_v17 = vpop.f32.mrf.mxu3 }
 0x5c2   :  { %v2809_v18 = vpop.f32.mrf.mxu1 }
 0x5c8   :  { %v2811_v19 = vpop.f32.mrf.mxu3 }
 0x5ca   :  { %v2813_v20 = vpop.f32.mrf.mxu1 }
 0x5d0   :  { %v2815_v21 = vpop.f32.mrf.mxu3 }
 0x5d2   :  { %v2817_v22 = vpop.f32.mrf.mxu1 }
 0x5d8   :  { %v2819_v23 = vpop.f32.mrf.mxu3 }
 0x5da   :  { %v2821_v24 = vpop.f32.mrf.mxu1 }
 0x5e0   :  { %v2823_v26 = vpop.f32.mrf.mxu3 }
 0x5e2   :  { %v2825_v28 = vpop.f32.mrf.mxu1 }
 0x5e8   :  { %v2832_v27 = vpop.f32.mrf.mxu3 }
 0x5ea   :  { %v1131_v30 = vpop.f32.mrf.mxu1 }
 0x5eb   :  { %v1148_v61 = vadd.f32 %v1131_v30, %v1055_v33 }
 0x5ed   :  { %v2154_v41 = vmul.f32 -1.442695, %v1148_v61 }
 0x5f0   :  { %v1144_v37 = vpop.f32.mrf.mxu3 }
 0x5f1   :  { %v1149_v34 = vadd.f32 %v1144_v37, %v1056_v15  ;;  %v1002_v37 = vpop.f32.mrf.mxu2 }
 0x5f2   :  { %v1133_v38 = vpop.f32.mrf.mxu1 }
 0x5f3   :  { %2331 = vtanh.f32 %v1149_v34  ;;  %v2155_v4 = vmul.f32 -1.442695, %v1149_v34  ;;  %v1003_v34 = vadd.f32 %v1002_v37, %v2801_v14 }
 0x5f4   :  { %2333 = vpow2.f32 %v2154_v41 }
 0x5f5   :  { %v1057_v38 = vadd.f32 %v2830_v32, %v1003_v34 }
 0x5f8   :  { %v1146_v43 = vpop.f32.mrf.mxu3 }
 0x5f9   :  { %v2332_v40 = vpop.eup %2331  ;;  %v1031_v43 = vpop.f32.mrf.mxu0 }
 0x5fa   :  { %1191 = vrot.lane.b32.xlu1 %v2332_v40, %s2461_s7  ;;  %v2334_v50 = vpop.eup %2333  ;;  %v1032_v41 = vadd.f32 %v1031_v43, %v2803_v1 }
 0x5fb   :  { %v1156_v44 = vadd.f32 1.0, %v2334_v50 }
 0x5fd   :  { %2335 = vrcp.f32 %v1156_v44  ;;  %v1169_v11 = vand.u32 2147483648, %v1156_v44  ;;  %vm1163_vm3 = vweird.f32 %v1156_v44  ;;  %v1167_v51 = vand.u32 2147483647, %v1156_v44 }
 0x5ff   :  { %v1170_v8 = vor.u32 1.1754944e-38, %v1169_v11  ;;  %vm1168_vm4 = vcmp.eq.f32.partialorder %v1167_v51, 8.507059e+37 }
 0x603   :  { %v2336_v57 = vpop.eup %2335 }
 0x604   :  { %v1159_v46 = vmul.f32 %v2336_v57, %v1156_v44  ;;  %vm1164_vm9 = vweird.f32 %v2336_v57  ;;  %v1058_v44 = vadd.f32 %v2835_v36, %v1032_v41 }
 0x605   :  { %vm1165_vm7 = vmor %vm1163_vm3, %vm1164_vm9 }
 0x606   :  { %v1160_v3 = vsub.f32 1.0, %v1159_v46 }
 0x608   :  { %v1161_v48 = vmul.f32 %v2336_v57, %v1160_v3 }
 0x60a   :  { %v1162_v49 = vadd.f32 %v2336_v57, %v1161_v48 }
 0x60c   :  { %v1166_v52 = vsel %vm1165_vm7, %v2336_v57, %v1162_v49 }
 0x60d   :  { %v1171_v56 = vsel %vm1168_vm4, %v1170_v8, %v1166_v52 }
 0x60e   :  { %v1189_v59 = vmul.f32 0.0, %v1171_v56 }
 0x66c   :  { %v1192_v42 = vpop.permute.xlu1 %1191 }
 0x66d   :  { %v1194_v58 = vmul.f32 %v1192_v42, %v1171_v56 }
 0x66f   :  { %1196 = vrot.lane.b32.xlu0 %v1194_v58, %s2461_s7 }
 0x6e1   :  { %v1197_v63 = vpop.permute.xlu0 %1196 }
 0x6e2   :  { %v2840_v0 = vadd.f32 %v1197_v63, %v1189_v59 }
 0x6e4   :  { %2337 = vtanh.f32 %v2840_v0 }
 0x6e5   :  { %2339 = vpow2.f32 %v2155_v4 }
 0x6ea   :  { %v2338_v2 = vpop.eup %2337 }
 0x6eb   :  { %1202 = vrot.lane.b32.xlu2 %v2338_v2, %s2461_s7  ;;  %v2340_v5 = vpop.eup %2339 }
 0x6ec   :  { %v1157_v7 = vadd.f32 1.0, %v2340_v5 }
 0x6ee   :  { %2341 = vrcp.f32 %v1157_v7  ;;  %v1184_v29 = vand.u32 2147483648, %v1157_v7  ;;  %vm1178_vm10 = vweird.f32 %v1157_v7  ;;  %v1182_v31 = vand.u32 2147483647, %v1157_v7 }
 0x6f0   :  { %v1185_v35 = vor.u32 1.1754944e-38, %v1184_v29  ;;  %vm1183_vm13 = vcmp.eq.f32.partialorder %v1182_v31, 8.507059e+37 }
 0x6f4   :  { %v2342_v9 = vpop.eup %2341 }
 0x6f5   :  { %v1174_v10 = vmul.f32 %v2342_v9, %v1157_v7  ;;  %vm1179_vm12 = vweird.f32 %v2342_v9 }
 0x6f6   :  { %vm1180_vm11 = vmor %vm1178_vm10, %vm1179_vm12 }
 0x6f7   :  { %v1175_v12 = vsub.f32 1.0, %v1174_v10 }
 0x6f9   :  { %v1176_v13 = vmul.f32 %v2342_v9, %v1175_v12 }
 0x6fb   :  { %v1177_v25 = vadd.f32 %v2342_v9, %v1176_v13 }
 0x6fd   :  { %v1181_v33 = vsel %vm1180_vm11, %v2342_v9, %v1177_v25 }
 0x6fe   :  { %v1186_v30 = vsel %vm1183_vm13, %v1185_v35, %v1181_v33 }
 0x745   :  { %v1203_v60 = vpop.permute.xlu2 %1202 }
 0x746   :  { %v1205_v61 = vmul.f32 %v1203_v60, %v1186_v30 }
 0x748   :  { %v1206_v15 = vpack.c.bf16 %v1205_v61, %v1205_v61 }
 0x74a   :  { %2156 = vmatmul.msk.bf16.vlgmr.msrb.gmra.mxu1 %vm456_vm6, %v1206_v15  ;;  %2157 = vmatmul.msk.bf16.vlgmr.msrb.gmra.mxu3 %vm456_vm6, %v1206_v15 }
 0x74b   :  { %1390 = vmatpush.bf16.msrb.mxu1 %v2756_v54  ;;  %1478 = vmatpush.bf16.msrb.mxu3 %v2756_v54 }
 0x74f   :  { %1391 = vmatpush.bf16.msrb.mxu1 %v2764_v62  ;;  %1479 = vmatpush.bf16.msrb.mxu3 %v2764_v62 }
 0x753   :  { %1392 = vmatpush.bf16.msrb.mxu1 %v2768_v55  ;;  %1480 = vmatpush.bf16.msrb.mxu3 %v2768_v55 }
 0x757   :  { %1393 = vmatpush.bf16.msrb.mxu1 %v2776_v6  ;;  %1481 = vmatpush.bf16.msrb.mxu3 %v2776_v6 }
 0x7c7   :  { %v1219_v40 = vpop.f32.mrf.mxu1 }
 0x7c8   :  { %v1236_v50 = vadd.f32 %v1219_v40, %v1057_v38 }
 0x7ca   :  { %v2158_v11 = vmul.f32 -1.442695, %v1236_v50  ;;  %v1005_v50 = vpop.f32.mrf.mxu2 }
 0x7cd   :  { %v1232_v57 = vpop.f32.mrf.mxu3 }
 0x7ce   :  { %v1237_v46 = vadd.f32 %v1232_v57, %v1058_v44  ;;  %v1006_v44 = vadd.f32 %v1005_v50, %v2805_v16 }
 0x7cf   :  { %v1221_v3 = vpop.f32.mrf.mxu1 }
 0x7d0   :  { %2343 = vtanh.f32 %v1237_v46  ;;  %v2159_v25 = vmul.f32 -1.442695, %v1237_v46  ;;  %v1059_v57 = vadd.f32 %v2830_v32, %v1006_v44  ;;  %v1034_v46 = vpop.f32.mrf.mxu0 }
 0x7d1   :  { %2345 = vpow2.f32 %v2158_v11 }
 0x7d5   :  { %v1234_v48 = vpop.f32.mrf.mxu3 }
 0x7d6   :  { %v2344_v49 = vpop.eup %2343  ;;  %v1035_v48 = vadd.f32 %v1034_v46, %v2807_v17 }
 0x7d7   :  { %1279 = vrot.lane.b32.xlu0 %v2344_v49, %s2461_s7  ;;  %v2346_v14 = vpop.eup %2345 }
 0x7d8   :  { %v1244_v51 = vadd.f32 1.0, %v2346_v14  ;;  %v1060_v11 = vadd.f32 %v2835_v36, %v1035_v48 }
 0x7da   :  { %2347 = vrcp.f32 %v1244_v51  ;;  %v1257_v58 = vand.u32 2147483648, %v1244_v51  ;;  %vm1251_vm15 = vweird.f32 %v1244_v51  ;;  %v1255_v59 = vand.u32 2147483647, %v1244_v51 }
 0x7dc   :  { %v1258_v2 = vor.u32 1.1754944e-38, %v1257_v58  ;;  %vm1256_vm0 = vcmp.eq.f32.partialorder %v1255_v59, 8.507059e+37 }
 0x7e0   :  { %v2348_v52 = vpop.eup %2347 }
 0x7e1   :  { %v1247_v8 = vmul.f32 %v2348_v52, %v1244_v51  ;;  %vm1252_vm14 = vweird.f32 %v2348_v52 }
 0x7e2   :  { %vm1253_vm8 = vmor %vm1251_vm15, %vm1252_vm14 }
 0x7e3   :  { %v1248_v42 = vsub.f32 1.0, %v1247_v8 }
 0x7e5   :  { %v1249_v1 = vmul.f32 %v2348_v52, %v1248_v42 }
 0x7e7   :  { %v1250_v56 = vadd.f32 %v2348_v52, %v1249_v1 }
 0x7e9   :  { %v1254_v63 = vsel %vm1253_vm8, %v2348_v52, %v1250_v56 }
 0x7ea   :  { %v1259_v5 = vsel %vm1256_vm0, %v1258_v2, %v1254_v63 }
 0x7eb   :  { %v1277_v9 = vmul.f32 %v1259_v5, %v2840_v0 }
 0x849   :  { %v1280_v4 = vpop.permute.xlu0 %1279 }
 0x84a   :  { %v1282_v7 = vmul.f32 %v1280_v4, %v1259_v5 }
 0x84c   :  { %1284 = vrot.lane.b32.xlu1 %v1282_v7, %s2461_s7 }
 0x8be   :  { %v1285_v10 = vpop.permute.xlu1 %1284 }
 0x8bf   :  { %v2861_v12 = vadd.f32 %v1285_v10, %v1277_v9 }
 0x8c1   :  { %2349 = vtanh.f32 %v2861_v12 }
 0x8c2   :  { %2351 = vpow2.f32 %v2159_v25 }
 0x8c7   :  { %v2350_v13 = vpop.eup %2349 }
 0x8c8   :  { %1290 = vrot.lane.b32.xlu2 %v2350_v13, %s2461_s7  ;;  %v2352_v29 = vpop.eup %2351 }
 0x8c9   :  { %v1245_v31 = vadd.f32 1.0, %v2352_v29 }
 0x8cb   :  { %2353 = vrcp.f32 %v1245_v31  ;;  %v1272_v0 = vand.u32 2147483648, %v1245_v31  ;;  %vm1266_vm2 = vweird.f32 %v1245_v31  ;;  %v1270_v15 = vand.u32 2147483647, %v1245_v31 }
 0x8cd   :  { %v1273_v34 = vor.u32 1.1754944e-38, %v1272_v0  ;;  %vm1271_vm9 = vcmp.eq.f32.partialorder %v1270_v15, 8.507059e+37 }
 0x8d1   :  { %v2354_v33 = vpop.eup %2353 }
 0x8d2   :  { %v1262_v35 = vmul.f32 %v2354_v33, %v1245_v31  ;;  %vm1267_vm1 = vweird.f32 %v2354_v33 }
 0x8d3   :  { %vm1268_vm5 = vmor %vm1266_vm2, %vm1267_vm1 }
 0x8d4   :  { %v1263_v30 = vsub.f32 1.0, %v1262_v35 }
 0x8d6   :  { %v1264_v60 = vmul.f32 %v2354_v33, %v1263_v30 }
 0x8d8   :  { %v1265_v61 = vadd.f32 %v2354_v33, %v1264_v60 }
 0x8da   :  { %v1269_v37 = vsel %vm1268_vm5, %v2354_v33, %v1265_v61 }
 0x8db   :  { %v1274_v38 = vsel %vm1271_vm9, %v1273_v34, %v1269_v37 }
 0x922   :  { %v1291_v43 = vpop.permute.xlu2 %1290 }
 0x923   :  { %v1293_v40 = vmul.f32 %v1291_v43, %v1274_v38 }
 0x925   :  { %v1294_v41 = vpack.c.bf16 %v1293_v40, %v1293_v40 }
 0x927   :  { %2160 = vmatmul.msk.bf16.vlgmr.msra.gmra.mxu1 %vm456_vm6, %v1294_v41  ;;  %2161 = vmatmul.msk.bf16.vlgmr.msra.gmra.mxu3 %vm456_vm6, %v1294_v41 }
 0x928   :  { %1566 = vmatpush.bf16.msra.mxu1 %v2756_v54  ;;  %1654 = vmatpush.bf16.msra.mxu3 %v2756_v54 }
 0x92c   :  { %1567 = vmatpush.bf16.msra.mxu1 %v2764_v62  ;;  %1655 = vmatpush.bf16.msra.mxu3 %v2764_v62 }
 0x930   :  { %1568 = vmatpush.bf16.msra.mxu1 %v2768_v55  ;;  %1656 = vmatpush.bf16.msra.mxu3 %v2768_v55 }
 0x934   :  { %1569 = vmatpush.bf16.msra.mxu1 %v2776_v6  ;;  %1657 = vmatpush.bf16.msra.mxu3 %v2776_v6 }
 0x9a4   :  { %v1307_v3 = vpop.f32.mrf.mxu1 }
 0x9a5   :  { %v1324_v49 = vadd.f32 %v1307_v3, %v1059_v57  ;;  %v1007_v3 = vpop.f32.mrf.mxu2 }
 0x9a7   :  { %v2162_v1 = vmul.f32 -1.442695, %v1324_v49 }
 0x9aa   :  { %v1320_v14 = vpop.f32.mrf.mxu3 }
 0x9ab   :  { %v1325_v51 = vadd.f32 %v1320_v14, %v1060_v11 }
 0x9ac   :  { %v1309_v52 = vpop.f32.mrf.mxu1 }
 0x9ad   :  { %2355 = vtanh.f32 %v1325_v51  ;;  %v2163_v30 = vmul.f32 -1.442695, %v1325_v51  ;;  %v2896_v48 = vpop.f32.mrf.mxu2 }
 0x9ae   :  { %2357 = vpow2.f32 %v2162_v1 }
 0x9b2   :  { %v1322_v8 = vpop.f32.mrf.mxu3 }
 0x9b3   :  { %v2356_v42 = vpop.eup %2355 }
 0x9b4   :  { %1367 = vrot.lane.b32.xlu0 %v2356_v42, %s2461_s7  ;;  %v2358_v16 = vpop.eup %2357 }
 0x9b5   :  { %v1332_v56 = vadd.f32 1.0, %v2358_v16  ;;  %v2898_v49 = vpop.f32.mrf.mxu2 }
 0x9b7   :  { %2359 = vrcp.f32 %v1332_v56  ;;  %v1345_v4 = vand.u32 2147483648, %v1332_v56  ;;  %vm1339_vm7 = vweird.f32 %v1332_v56  ;;  %v1343_v5 = vand.u32 2147483647, %v1332_v56 }
 0x9b9   :  { %v1346_v9 = vor.u32 1.1754944e-38, %v1345_v4  ;;  %vm1344_vm12 = vcmp.eq.f32.partialorder %v1343_v5, 8.507059e+37 }
 0x9bd   :  { %v2360_v58 = vpop.eup %2359 }
 0x9be   :  { %v1335_v59 = vmul.f32 %v2360_v58, %v1332_v56  ;;  %vm1340_vm3 = vweird.f32 %v2360_v58 }
 0x9bf   :  { %vm1341_vm4 = vmor %vm1339_vm7, %vm1340_vm3 }
 0x9c0   :  { %v1336_v63 = vsub.f32 1.0, %v1335_v59 }
 0x9c2   :  { %v1337_v17 = vmul.f32 %v2360_v58, %v1336_v63 }
 0x9c4   :  { %v1338_v2 = vadd.f32 %v2360_v58, %v1337_v17 }
 0x9c6   :  { %v1342_v7 = vsel %vm1341_vm4, %v2360_v58, %v1338_v2 }
 0x9c7   :  { %v1347_v13 = vsel %vm1344_vm12, %v1346_v9, %v1342_v7 }
 0x9c8   :  { %v1365_v29 = vmul.f32 %v1347_v13, %v2861_v12 }
 0xa26   :  { %v1368_v10 = vpop.permute.xlu0 %1367 }
 0xa27   :  { %v1370_v25 = vmul.f32 %v1368_v10, %v1347_v13 }
 0xa29   :  { %1372 = vrot.lane.b32.xlu1 %v1370_v25, %s2461_s7 }
 0xa9b   :  { %v1373_v31 = vpop.permute.xlu1 %1372 }
 0xa9c   :  { %v2882_v33 = vadd.f32 %v1373_v31, %v1365_v29 }
 0xa9e   :  { %2361 = vtanh.f32 %v2882_v33 }
 0xa9f   :  { %2363 = vpow2.f32 %v2163_v30 }
 0xaa4   :  { %v2362_v35 = vpop.eup %2361 }
 0xaa5   :  { %1378 = vrot.lane.b32.xlu2 %v2362_v35, %s2461_s7  ;;  %v2364_v60 = vpop.eup %2363 }
 0xaa6   :  { %v1333_v61 = vadd.f32 1.0, %v2364_v60 }
 0xaa8   :  { %2365 = vrcp.f32 %v1333_v61  ;;  %v1360_v12 = vand.u32 2147483648, %v1333_v61  ;;  %vm1354_vm11 = vweird.f32 %v1333_v61  ;;  %v1358_v43 = vand.u32 2147483647, %v1333_v61 }
 0xaaa   :  { %v1361_v41 = vor.u32 1.1754944e-38, %v1360_v12  ;;  %vm1359_vm14 = vcmp.eq.f32.partialorder %v1358_v43, 8.507059e+37 }
 0xaae   :  { %v2366_v0 = vpop.eup %2365 }
 0xaaf   :  { %v1350_v15 = vmul.f32 %v2366_v0, %v1333_v61  ;;  %vm1355_vm10 = vweird.f32 %v2366_v0 }
 0xab0   :  { %vm1356_vm13 = vmor %vm1354_vm11, %vm1355_vm10 }
 0xab1   :  { %v1351_v37 = vsub.f32 1.0, %v1350_v15 }
 0xab3   :  { %v1352_v34 = vmul.f32 %v2366_v0, %v1351_v37 }
 0xab5   :  { %v1353_v38 = vadd.f32 %v2366_v0, %v1352_v34 }
 0xab7   :  { %v1357_v40 = vsel %vm1356_vm13, %v2366_v0, %v1353_v38 }
 0xab8   :  { %v1362_v50 = vsel %vm1359_vm14, %v1361_v41, %v1357_v40 }
 0xaff   :  { %v1379_v44 = vpop.permute.xlu2 %1378 }
 0xb00   :  { %v1381_v57 = vmul.f32 %v1379_v44, %v1362_v50 }
 0xb02   :  { %v1382_v46 = vpack.c.bf16 %v1381_v57, %v1381_v57 }
 0xb04   :  { %2164 = vmatmul.msk.bf16.vlgmr.msrb.gmra.mxu1 %vm456_vm6, %v1382_v46  ;;  %2165 = vmatmul.msk.bf16.vlgmr.msrb.gmra.mxu2 %vm456_vm6, %v1382_v46 }
 0xb05   :  { %1755 = vmatpush.bf16.msrb.mxu2 %v2731_v39  ;;  %1742 = vmatpush.bf16.msrb.mxu1 %v2756_v54  ;;  %v2900_v39 = vpop.f32.mrf.mxu2  ;;  %v1008_v54 = vadd.f32 %v1007_v3, %v2809_v18 }
 0xb09   :  { %1756 = vmatpush.bf16.msrb.mxu2 %v2742_v45  ;;  %1743 = vmatpush.bf16.msrb.mxu1 %v2764_v62  ;;  %v1061_v62 = vadd.f32 %v2830_v32, %v1008_v54 }
 0xb0d   :  { %1757 = vmatpush.bf16.msrb.mxu2 %v2747_v47  ;;  %1744 = vmatpush.bf16.msrb.mxu1 %v2768_v55  ;;  %v2903_v45 = vpop.f32.mrf.mxu2  ;;  %v1036_v47 = vpop.f32.mrf.mxu0 }
 0xb0e   :  { %v1037_v55 = vadd.f32 %v1036_v47, %v2811_v19 }
 0xb11   :  { %1758 = vmatpush.bf16.msrb.mxu2 %v2754_v53  ;;  %1745 = vmatpush.bf16.msrb.mxu1 %v2776_v6  ;;  %v1062_v6 = vadd.f32 %v2835_v36, %v1037_v55  ;;  %v1011_v55 = vadd.f32 %v2896_v48, %v2813_v20 }
 0xb15   :  { %v1039_v57 = vpop.f32.mrf.mxu0 }
 0xb1d   :  { %v2917_v46 = vpop.f32.mrf.mxu0 }
 0xb25   :  { %v2919_v3 = vpop.f32.mrf.mxu0 }
 0xb2d   :  { %v2921_v54 = vpop.f32.mrf.mxu0 }
 0xb81   :  { %v1395_v11 = vpop.f32.mrf.mxu1 }
 0xb82   :  { %v1412_v53 = vadd.f32 %v1395_v11, %v1061_v62  ;;  %v1040_v62 = vadd.f32 %v1039_v57, %v2815_v21  ;;  %v1042_v57 = vadd.f32 %v2917_v46, %v2819_v23 }
 0xb84   :  { %v2166_v18 = vmul.f32 -1.442695, %v1412_v53  ;;  %v1064_v47 = vadd.f32 %v2835_v36, %v1040_v62 }
 0xb87   :  { %v1408_v14 = vpop.f32.mrf.mxu2 }
 0xb88   :  { %v1413_v51 = vadd.f32 %v1408_v14, %v1062_v6  ;;  %v1063_v6 = vadd.f32 %v2830_v32, %v1011_v55 }
 0xb89   :  { %v1397_v52 = vpop.f32.mrf.mxu1 }
 0xb8a   :  { %2367 = vtanh.f32 %v1413_v51  ;;  %v2167_v35 = vmul.f32 -1.442695, %v1413_v51 }
 0xb8b   :  { %2369 = vpow2.f32 %v2166_v18 }
 0xb8f   :  { %v1410_v8 = vpop.f32.mrf.mxu2 }
 0xb90   :  { %v2368_v42 = vpop.eup %2367 }
 0xb91   :  { %1455 = vrot.lane.b32.xlu0 %v2368_v42, %s2461_s7  ;;  %v2370_v1 = vpop.eup %2369 }
 0xb92   :  { %v1420_v16 = vadd.f32 1.0, %v2370_v1 }
 0xb94   :  { %2371 = vrcp.f32 %v1420_v16  ;;  %v1433_v17 = vand.u32 2147483648, %v1420_v16  ;;  %vm1427_vm8 = vweird.f32 %v1420_v16  ;;  %v1431_v2 = vand.u32 2147483647, %v1420_v16 }
 0xb96   :  { %v1434_v5 = vor.u32 1.1754944e-38, %v1433_v17  ;;  %vm1432_vm1 = vcmp.eq.f32.partialorder %v1431_v2, 8.507059e+37 }
 0xb9a   :  { %v2372_v56 = vpop.eup %2371 }
 0xb9b   :  { %v1423_v58 = vmul.f32 %v2372_v56, %v1420_v16  ;;  %vm1428_vm15 = vweird.f32 %v2372_v56 }
 0xb9c   :  { %vm1429_vm0 = vmor %vm1427_vm8, %vm1428_vm15 }
 0xb9d   :  { %v1424_v59 = vsub.f32 1.0, %v1423_v58 }
 0xb9f   :  { %v1425_v19 = vmul.f32 %v2372_v56, %v1424_v59 }
 0xba1   :  { %v1426_v63 = vadd.f32 %v2372_v56, %v1425_v19 }
 0xba3   :  { %v1430_v4 = vsel %vm1429_vm0, %v2372_v56, %v1426_v63 }
 0xba4   :  { %v1435_v9 = vsel %vm1432_vm1, %v1434_v5, %v1430_v4 }
 0xba5   :  { %v1453_v13 = vmul.f32 %v1435_v9, %v2882_v33 }
 0xc03   :  { %v1456_v7 = vpop.permute.xlu0 %1455 }
 0xc04   :  { %v1458_v10 = vmul.f32 %v1456_v7, %v1435_v9 }
 0xc06   :  { %1460 = vrot.lane.b32.xlu1 %v1458_v10, %s2461_s7 }
 0xc78   :  { %v1461_v25 = vpop.permute.xlu1 %1460 }
 0xc79   :  { %v2911_v29 = vadd.f32 %v1461_v25, %v1453_v13 }
 0xc7b   :  { %2373 = vtanh.f32 %v2911_v29 }
 0xc7c   :  { %2375 = vpow2.f32 %v2167_v35 }
 0xc81   :  { %v2374_v31 = vpop.eup %2373 }
 0xc82   :  { %1466 = vrot.lane.b32.xlu2 %v2374_v31, %s2461_s7  ;;  %v2376_v30 = vpop.eup %2375 }
 0xc83   :  { %v1421_v60 = vadd.f32 1.0, %v2376_v30 }
 0xc85   :  { %2377 = vrcp.f32 %v1421_v60  ;;  %v1448_v33 = vand.u32 2147483648, %v1421_v60  ;;  %vm1442_vm5 = vweird.f32 %v1421_v60  ;;  %v1446_v38 = vand.u32 2147483647, %v1421_v60 }
 0xc87   :  { %v1449_v43 = vor.u32 1.1754944e-38, %v1448_v33  ;;  %vm1447_vm3 = vcmp.eq.f32.partialorder %v1446_v38, 8.507059e+37 }
 0xc8b   :  { %v2378_v61 = vpop.eup %2377 }
 0xc8c   :  { %v1438_v0 = vmul.f32 %v2378_v61, %v1421_v60  ;;  %vm1443_vm2 = vweird.f32 %v2378_v61 }
 0xc8d   :  { %vm1444_vm9 = vmor %vm1442_vm5, %vm1443_vm2 }
 0xc8e   :  { %v1439_v15 = vsub.f32 1.0, %v1438_v0 }
 0xc90   :  { %v1440_v37 = vmul.f32 %v2378_v61, %v1439_v15 }
 0xc92   :  { %v1441_v34 = vadd.f32 %v2378_v61, %v1440_v37 }
 0xc94   :  { %v1445_v12 = vsel %vm1444_vm9, %v2378_v61, %v1441_v34 }
 0xc95   :  { %v1450_v40 = vsel %vm1447_vm3, %v1449_v43, %v1445_v12 }
 0xcdc   :  { %v1467_v41 = vpop.permute.xlu2 %1466 }
 0xcdd   :  { %v1469_v50 = vmul.f32 %v1467_v41, %v1450_v40  ;;  %v1013_v41 = vadd.f32 %v2898_v49, %v2817_v22 }
 0xcdf   :  { %v1470_v44 = vpack.c.bf16 %v1469_v50, %v1469_v50  ;;  %v1065_v50 = vadd.f32 %v2830_v32, %v1013_v41 }
 0xce1   :  { %2168 = vmatmul.msk.bf16.vlgmr.msrb.gmra.mxu3 %vm456_vm6, %v1470_v44  ;;  %2169 = vmatmul.msk.bf16.vlgmr.msrb.gmra.mxu0 %vm456_vm6, %v1470_v44 }
 0xd5e   :  { %v1496_v11 = vpop.f32.mrf.mxu0 }
 0xd5f   :  { %v1501_v53 = vadd.f32 %v1496_v11, %v1064_v47  ;;  %v1066_v47 = vadd.f32 %v2835_v36, %v1042_v57 }
 0xd61   :  { %2379 = vtanh.f32 %v1501_v53  ;;  %v2171_v25 = vmul.f32 -1.442695, %v1501_v53 }
 0xd64   :  { %v1483_v14 = vpop.f32.mrf.mxu3 }
 0xd65   :  { %v1500_v51 = vadd.f32 %v1483_v14, %v1063_v6 }
 0xd66   :  { %v1498_v52 = vpop.f32.mrf.mxu0 }
 0xd67   :  { %v2380_v8 = vpop.eup %2379  ;;  %v2170_v18 = vmul.f32 -1.442695, %v1500_v51 }
 0xd68   :  { %1543 = vrot.lane.b32.xlu0 %v2380_v8, %s2461_s7 }
 0xd69   :  { %2381 = vpow2.f32 %v2170_v18 }
 0xd6c   :  { %v1485_v42 = vpop.f32.mrf.mxu3 }
 0xd6f   :  { %v2382_v21 = vpop.eup %2381 }
 0xd70   :  { %v1508_v1 = vadd.f32 1.0, %v2382_v21 }
 0xd72   :  { %2383 = vrcp.f32 %v1508_v1  ;;  %v1521_v59 = vand.u32 2147483648, %v1508_v1  ;;  %vm1515_vm4 = vweird.f32 %v1508_v1  ;;  %v1519_v19 = vand.u32 2147483647, %v1508_v1 }
 0xd74   :  { %v1522_v17 = vor.u32 1.1754944e-38, %v1521_v59  ;;  %vm1520_vm10 = vcmp.eq.f32.partialorder %v1519_v19, 8.507059e+37 }
 0xd78   :  { %v2384_v16 = vpop.eup %2383 }
 0xd79   :  { %v1511_v56 = vmul.f32 %v2384_v16, %v1508_v1  ;;  %vm1516_vm7 = vweird.f32 %v2384_v16 }
 0xd7a   :  { %vm1517_vm12 = vmor %vm1515_vm4, %vm1516_vm7 }
 0xd7b   :  { %v1512_v58 = vsub.f32 1.0, %v1511_v56 }
 0xd7d   :  { %v1513_v20 = vmul.f32 %v2384_v16, %v1512_v58 }
 0xd7f   :  { %v1514_v48 = vadd.f32 %v2384_v16, %v1513_v20 }
 0xd81   :  { %v1518_v63 = vsel %vm1517_vm12, %v2384_v16, %v1514_v48 }
 0xd82   :  { %v1523_v4 = vsel %vm1520_vm10, %v1522_v17, %v1518_v63 }
 0xd83   :  { %v1541_v7 = vmul.f32 %v1523_v4, %v2911_v29 }
 0xdda   :  { %v1544_v2 = vpop.permute.xlu0 %1543 }
 0xddb   :  { %v1546_v5 = vmul.f32 %v1544_v2, %v1523_v4 }
 0xddd   :  { %1548 = vrot.lane.b32.xlu1 %v1546_v5, %s2461_s7 }
 0xe4f   :  { %v1549_v9 = vpop.permute.xlu1 %1548 }
 0xe50   :  { %v2931_v10 = vadd.f32 %v1549_v9, %v1541_v7 }
 0xe52   :  { %2385 = vtanh.f32 %v2931_v10 }
 0xe53   :  { %2387 = vpow2.f32 %v2171_v25 }
 0xe58   :  { %v2386_v13 = vpop.eup %2385 }
 0xe59   :  { %1554 = vrot.lane.b32.xlu2 %v2386_v13, %s2461_s7  ;;  %v2388_v31 = vpop.eup %2387 }
 0xe5a   :  { %v1509_v35 = vadd.f32 1.0, %v2388_v31 }
 0xe5c   :  { %2389 = vrcp.f32 %v1509_v35  ;;  %v1536_v29 = vand.u32 2147483648, %v1509_v35  ;;  %vm1530_vm13 = vweird.f32 %v1509_v35  ;;  %v1534_v37 = vand.u32 2147483647, %v1509_v35 }
 0xe5e   :  { %v1537_v33 = vor.u32 1.1754944e-38, %v1536_v29  ;;  %vm1535_vm15 = vcmp.eq.f32.partialorder %v1534_v37, 8.507059e+37  ;;  %v1045_v29 = vadd.f32 %v2919_v3, %v2823_v26 }
 0xe60   :  { %v1068_v37 = vadd.f32 %v2835_v36, %v1045_v29 }
 0xe62   :  { %v2390_v30 = vpop.eup %2389 }
 0xe63   :  { %v1526_v60 = vmul.f32 %v2390_v30, %v1509_v35  ;;  %vm1531_vm11 = vweird.f32 %v2390_v30 }
 0xe64   :  { %vm1532_vm14 = vmor %vm1530_vm13, %vm1531_vm11 }
 0xe65   :  { %v1527_v61 = vsub.f32 1.0, %v1526_v60 }
 0xe67   :  { %v1528_v0 = vmul.f32 %v2390_v30, %v1527_v61 }
 0xe69   :  { %v1529_v15 = vadd.f32 %v2390_v30, %v1528_v0 }
 0xe6b   :  { %v1533_v34 = vsel %vm1532_vm14, %v2390_v30, %v1529_v15 }
 0xe6c   :  { %v1538_v38 = vsel %vm1535_vm15, %v1537_v33, %v1533_v34  ;;  %v1016_v33 = vadd.f32 %v2900_v39, %v2821_v24 }
 0xeb3   :  { %v1555_v12 = vpop.permute.xlu2 %1554 }
 0xeb4   :  { %v1557_v43 = vmul.f32 %v1555_v12, %v1538_v38  ;;  %v1067_v12 = vadd.f32 %v2830_v32, %v1016_v33 }
 0xeb6   :  { %v1558_v40 = vpack.c.bf16 %v1557_v43, %v1557_v43 }
 0xeb8   :  { %2172 = vmatmul.msk.bf16.vlgmr.msra.gmra.mxu1 %vm456_vm6, %v1558_v40  ;;  %2173 = vmatmul.msk.bf16.vlgmr.msra.gmra.mxu2 %vm456_vm6, %v1558_v40 }
 0xf35   :  { %v1571_v44 = vpop.f32.mrf.mxu1 }
 0xf36   :  { %v1588_v62 = vadd.f32 %v1571_v44, %v1065_v50 }
 0xf38   :  { %v2174_v51 = vmul.f32 -1.442695, %v1588_v62 }
 0xf3b   :  { %v1584_v11 = vpop.f32.mrf.mxu2 }
 0xf3c   :  { %v1589_v55 = vadd.f32 %v1584_v11, %v1066_v47 }
 0xf3d   :  { %v1573_v53 = vpop.f32.mrf.mxu1 }
 0xf3e   :  { %2391 = vtanh.f32 %v1589_v55  ;;  %v2175_v17 = vmul.f32 -1.442695, %v1589_v55 }
 0xf3f   :  { %2393 = vpow2.f32 %v2174_v51 }
 0xf43   :  { %v1586_v6 = vpop.f32.mrf.mxu2 }
 0xf44   :  { %v2392_v14 = vpop.eup %2391 }
 0xf45   :  { %1631 = vrot.lane.b32.xlu0 %v2392_v14, %s2461_s7  ;;  %v2394_v22 = vpop.eup %2393 }
 0xf46   :  { %v1596_v49 = vadd.f32 1.0, %v2394_v22 }
 0xf48   :  { %2395 = vrcp.f32 %v1596_v49  ;;  %v1609_v18 = vand.u32 2147483648, %v1596_v49  ;;  %vm1603_vm0 = vweird.f32 %v1596_v49  ;;  %v1607_v21 = vand.u32 2147483647, %v1596_v49 }
 0xf4a   :  { %v1610_v16 = vor.u32 1.1754944e-38, %v1609_v18  ;;  %vm1608_vm2 = vcmp.eq.f32.partialorder %v1607_v21, 8.507059e+37 }
 0xf4e   :  { %v2396_v52 = vpop.eup %2395 }
 0xf4f   :  { %v1599_v8 = vmul.f32 %v2396_v52, %v1596_v49  ;;  %vm1604_vm8 = vweird.f32 %v2396_v52 }
 0xf50   :  { %vm1605_vm1 = vmor %vm1603_vm0, %vm1604_vm8 }
 0xf51   :  { %v1600_v42 = vsub.f32 1.0, %v1599_v8 }
 0xf53   :  { %v1601_v23 = vmul.f32 %v2396_v52, %v1600_v42 }
 0xf55   :  { %v1602_v46 = vadd.f32 %v2396_v52, %v1601_v23 }
 0xf57   :  { %v1606_v1 = vsel %vm1605_vm1, %v2396_v52, %v1602_v46 }
 0xf58   :  { %v1611_v58 = vsel %vm1608_vm2, %v1610_v16, %v1606_v1 }
 0xf59   :  { %v1629_v48 = vmul.f32 %v1611_v58, %v2931_v10 }
 0xfb7   :  { %v1632_v56 = vpop.permute.xlu0 %1631 }
 0xfb8   :  { %v1634_v20 = vmul.f32 %v1632_v56, %v1611_v58 }
 0xfba   :  { %1636 = vrot.lane.b32.xlu1 %v1634_v20, %s2461_s7 }
0x102c   :  { %v1637_v59 = vpop.permute.xlu1 %1636 }
0x102d   :  { %v2946_v19 = vadd.f32 %v1637_v59, %v1629_v48 }
0x102f   :  { %2397 = vtanh.f32 %v2946_v19 }
0x1030   :  { %2399 = vpow2.f32 %v2175_v17 }
0x1035   :  { %v2398_v63 = vpop.eup %2397 }
0x1036   :  { %1642 = vrot.lane.b32.xlu2 %v2398_v63, %s2461_s7  ;;  %v2400_v2 = vpop.eup %2399 }
0x1037   :  { %v1597_v4 = vadd.f32 1.0, %v2400_v2 }
0x1039   :  { %2401 = vrcp.f32 %v1597_v4  ;;  %v1624_v10 = vand.u32 2147483648, %v1597_v4  ;;  %vm1618_vm9 = vweird.f32 %v1597_v4  ;;  %v1622_v31 = vand.u32 2147483647, %v1597_v4 }
0x103b   :  { %v1625_v30 = vor.u32 1.1754944e-38, %v1624_v10  ;;  %vm1623_vm7 = vcmp.eq.f32.partialorder %v1622_v31, 8.507059e+37 }
0x103f   :  { %v2402_v5 = vpop.eup %2401 }
0x1040   :  { %v1614_v7 = vmul.f32 %v2402_v5, %v1597_v4  ;;  %vm1619_vm5 = vweird.f32 %v2402_v5 }
0x1041   :  { %vm1620_vm3 = vmor %vm1618_vm9, %vm1619_vm5 }
0x1042   :  { %v1615_v9 = vsub.f32 1.0, %v1614_v7  ;;  %v1018_v7 = vadd.f32 %v2903_v45, %v2825_v28 }
0x1044   :  { %v1616_v13 = vmul.f32 %v2402_v5, %v1615_v9  ;;  %v1069_v9 = vadd.f32 %v2830_v32, %v1018_v7 }
0x1046   :  { %v1617_v25 = vadd.f32 %v2402_v5, %v1616_v13 }
0x1048   :  { %v1621_v35 = vsel %vm1620_vm3, %v2402_v5, %v1617_v25  ;;  %v1047_v25 = vadd.f32 %v2921_v54, %v2832_v27 }
0x1049   :  { %v1626_v60 = vsel %vm1623_vm7, %v1625_v30, %v1621_v35 }
0x104a   :  { %v1070_v31 = vadd.f32 %v2835_v36, %v1047_v25 }
0x1090   :  { %v1643_v61 = vpop.permute.xlu2 %1642 }
0x1091   :  { %v1645_v0 = vmul.f32 %v1643_v61, %v1626_v60 }
0x1093   :  { %v1646_v15 = vpack.c.bf16 %v1645_v0, %v1645_v0 }
0x1095   :  { %2176 = vmatmul.msk.bf16.vlgmr.msra.gmra.mxu3 %vm456_vm6, %v1646_v15  ;;  %2177 = vmatmul.msk.bf16.vlgmr.msra.gmra.mxu0 %vm456_vm6, %v1646_v15 }
0x1112   :  { %v1672_v34 = vpop.f32.mrf.mxu0 }
0x1113   :  { %v1677_v38 = vadd.f32 %v1672_v34, %v1068_v37 }
0x1115   :  { %2403 = vtanh.f32 %v1677_v38  ;;  %v2179_v46 = vmul.f32 -1.442695, %v1677_v38 }
0x1118   :  { %v1659_v43 = vpop.f32.mrf.mxu3 }
0x1119   :  { %v1676_v40 = vadd.f32 %v1659_v43, %v1067_v12 }
0x111a   :  { %v1674_v41 = vpop.f32.mrf.mxu0 }
0x111b   :  { %v2404_v50 = vpop.eup %2403  ;;  %v2178_v57 = vmul.f32 -1.442695, %v1676_v40  ;;  %v2211_v41 = vld [vmem:[#allocation2 + $0x240] sm:$0xf] }
0x111c   :  { %1719 = vrot.lane.b32.xlu0 %v2404_v50, %s2461_s7  ;;  %v2270_v50 = vld [vmem:[#allocation2 + $0x244] sm:$0xf0] }
0x111d   :  { %2405 = vpow2.f32 %v2178_v57  ;;  %v2212_v57 = vor.u32 %v2270_v50, %v2211_v41 }
0x111f   :  { %1885 = vmatpush.bf16.msrb.mxu3 %v2212_v57 }
0x1120   :  { %v1661_v44 = vpop.f32.mrf.mxu3 }
0x1121   :  { %v2269_v44 = vld [vmem:[#allocation2 + $0x244] sm:$0xf] }
0x1123   :  { %v2406_v26 = vpop.eup %2405 }
0x1124   :  { %v1684_v3 = vadd.f32 1.0, %v2406_v26  ;;  %v2213_v26 = vld [vmem:[#allocation2 + $0x248] sm:$0xf0] }
0x1126   :  { %2407 = vrcp.f32 %v1684_v3  ;;  %v1697_v55 = vand.u32 2147483648, %v1684_v3  ;;  %vm1691_vm12 = vweird.f32 %v1684_v3  ;;  %v1695_v53 = vand.u32 2147483647, %v1684_v3 }
0x1128   :  { %v1698_v14 = vor.u32 1.1754944e-38, %v1697_v55  ;;  %vm1696_vm11 = vcmp.eq.f32.partialorder %v1695_v53, 8.507059e+37  ;;  %v2195_v53 = vld [vmem:[#allocation2 + $0x220] sm:$0xf] }
0x112c   :  { %v2408_v62 = vpop.eup %2407 }
0x112d   :  { %v1687_v47 = vmul.f32 %v2408_v62, %v1684_v3  ;;  %vm1692_vm4 = vweird.f32 %v2408_v62  ;;  %v2203_v3 = vld [vmem:[#allocation2 + $0x230] sm:$0xf] }
0x112e   :  { %vm1693_vm10 = vmor %vm1691_vm12, %vm1692_vm4 }
0x112f   :  { %v1688_v11 = vsub.f32 1.0, %v1687_v47  ;;  %v2216_v47 = vor.u32 %v2269_v44, %v2213_v26 }
0x1131   :  { %v1689_v24 = vmul.f32 %v2408_v62, %v1688_v11  ;;  %v2267_v11 = vld [vmem:[#allocation2 + $0x234] sm:$0xf]  ;;  %1898 = vmatpush.bf16.msrb.mxu0 %v2216_v47 }
0x1133   :  { %v1690_v39 = vadd.f32 %v2408_v62, %v1689_v24  ;;  %v2205_v24 = vld [vmem:[#allocation2 + $0x238] sm:$0xf0] }
0x1134   :  { %v2208_v55 = vor.u32 %v2267_v11, %v2205_v24 }
0x1135   :  { %v1694_v6 = vsel %vm1693_vm10, %v2408_v62, %v1690_v39  ;;  %v2268_v62 = vld [vmem:[#allocation2 + $0x234] sm:$0xf0] }
0x1136   :  { %v1699_v22 = vsel %vm1696_vm11, %v1698_v14, %v1694_v6  ;;  %v2204_v39 = vor.u32 %v2268_v62, %v2203_v3  ;;  %v2266_v6 = vld [vmem:[#allocation2 + $0x224] sm:$0xf0]  ;;  %v2265_v14 = vld [vmem:[#allocation2 + $0x224] sm:$0xf]  ;;  %1899 = vmatpush.bf16.msrb.mxu0 %v2208_v55 }
0x1137   :  { %v1717_v52 = vmul.f32 %v1699_v22, %v2946_v19 }
0x1138   :  { %1886 = vmatpush.bf16.msrb.mxu3 %v2204_v39 }
0x118e   :  { %v1720_v51 = vpop.permute.xlu0 %1719 }
0x118f   :  { %v1722_v49 = vmul.f32 %v1720_v51, %v1699_v22  ;;  %v2197_v51 = vld [vmem:[#allocation2 + $0x228] sm:$0xf0]  ;;  %v2196_v22 = vor.u32 %v2266_v6, %v2195_v53 }
0x1191   :  { %1724 = vrot.lane.b32.xlu1 %v1722_v49, %s2461_s7  ;;  %v2200_v49 = vor.u32 %v2265_v14, %v2197_v51  ;;  %1887 = vmatpush.bf16.msrb.mxu3 %v2196_v22 }
0x1193   :  { %1900 = vmatpush.bf16.msrb.mxu0 %v2200_v49 }
0x1203   :  { %v1725_v8 = vpop.permute.xlu1 %1724 }
0x1204   :  { %v2961_v42 = vadd.f32 %v1725_v8, %v1717_v52 }
0x1206   :  { %2409 = vtanh.f32 %v2961_v42 }
0x1207   :  { %2411 = vpow2.f32 %v2179_v46 }
0x120c   :  { %v2410_v23 = vpop.eup %2409 }
0x120d   :  { %1730 = vrot.lane.b32.xlu2 %v2410_v23, %s2461_s7  ;;  %v2412_v18 = vpop.eup %2411 }
0x120e   :  { %v1685_v21 = vadd.f32 1.0, %v2412_v18 }
0x1210   :  { %2413 = vrcp.f32 %v1685_v21  ;;  %v1712_v48 = vand.u32 2147483648, %v1685_v21  ;;  %vm1706_vm14 = vweird.f32 %v1685_v21  ;;  %v1710_v59 = vand.u32 2147483647, %v1685_v21 }
0x1212   :  { %v1713_v63 = vor.u32 1.1754944e-38, %v1712_v48  ;;  %vm1711_vm8 = vcmp.eq.f32.partialorder %v1710_v59, 8.507059e+37  ;;  %v2189_v48 = vld [vmem:[#allocation2 + $0x218] sm:$0xf0] }
0x1216   :  { %v2414_v1 = vpop.eup %2413 }
0x1217   :  { %v1702_v16 = vmul.f32 %v2414_v1, %v1685_v21  ;;  %vm1707_vm13 = vweird.f32 %v2414_v1 }
0x1218   :  { %vm1708_vm15 = vmor %vm1706_vm14, %vm1707_vm13 }
0x1219   :  { %v1703_v56 = vsub.f32 1.0, %v1702_v16  ;;  %v2187_v16 = vld [vmem:[#allocation2 + $0x210] sm:$0xf] }
0x121b   :  { %v1704_v58 = vmul.f32 %v2414_v1, %v1703_v56  ;;  %v2264_v56 = vld [vmem:[#allocation2 + $0x214] sm:$0xf0] }
0x121d   :  { %v1705_v20 = vadd.f32 %v2414_v1, %v1704_v58  ;;  %v2263_v58 = vld [vmem:[#allocation2 + $0x214] sm:$0xf] }
0x121e   :  { %v2192_v59 = vor.u32 %v2263_v58, %v2189_v48 }
0x121f   :  { %v1709_v19 = vsel %vm1708_vm15, %v2414_v1, %v1705_v20  ;;  %v2188_v20 = vor.u32 %v2264_v56, %v2187_v16 }
0x1220   :  { %v1714_v17 = vsel %vm1711_vm8, %v1713_v63, %v1709_v19  ;;  %1901 = vmatpush.bf16.msrb.mxu0 %v2192_v59 }
0x1221   :  { %1888 = vmatpush.bf16.msrb.mxu3 %v2188_v20 }
0x1267   :  { %v1731_v2 = vpop.permute.xlu2 %1730 }
0x1268   :  { %v1733_v4 = vmul.f32 %v1731_v2, %v1714_v17 }
0x126a   :  { %v1734_v5 = vpack.c.bf16 %v1733_v4, %v1733_v4 }
0x126c   :  { %2180 = vmatmul.msk.bf16.vlgmr.msrb.gmra.mxu1 %vm456_vm6, %v1734_v5  ;;  %2181 = vmatmul.msk.bf16.vlgmr.msrb.gmra.mxu2 %vm456_vm6, %v1734_v5 }
0x12e9   :  { %v1747_v13 = vpop.f32.mrf.mxu1 }
0x12ea   :  { %v1764_v10 = vadd.f32 %v1747_v13, %v1069_v9 }
0x12ec   :  { %v2182_v15 = vmul.f32 -1.442695, %v1764_v10 }
0x12ef   :  { %v1760_v35 = vpop.f32.mrf.mxu2 }
0x12f0   :  { %v1765_v30 = vadd.f32 %v1760_v35, %v1070_v31  ;;  %v2184_v35 = vld [vmem:[%s2990_s2 + $0x1] ss:$2 sm:$0x3] }
0x12f1   :  { %v1749_v60 = vpop.f32.mrf.mxu1 }
0x12f2   :  { %2415 = vtanh.f32 %v1765_v30  ;;  %v2183_v18 = vmul.f32 -1.442695, %v1765_v30  ;;  %v1835_v30 = vperm.slane %v2184_v35, 1 }
0x12f3   :  { %2417 = vpow2.f32 %v2182_v15 }
0x12f7   :  { %v1762_v61 = vpop.f32.mrf.mxu2 }
0x12f8   :  { %v2416_v0 = vpop.eup %2415 }
0x12f9   :  { %1807 = vrot.lane.b32.xlu0 %v2416_v0, %s2461_s7  ;;  %v2418_v28 = vpop.eup %2417  ;;  %v1834_v0 = vperm.slane %v2184_v35, 0 }
0x12fa   :  { %v1772_v45 = vadd.f32 1.0, %v2418_v28 }
0x12fc   :  { %2419 = vrcp.f32 %v1772_v45  ;;  %v1785_v36 = vand.u32 2147483648, %v1772_v45  ;;  %vm1779_vm1 = vweird.f32 %v1772_v45  ;;  %v1783_v34 = vand.u32 2147483647, %v1772_v45 }
0x12fe   :  { %v1786_v38 = vor.u32 1.1754944e-38, %v1785_v36  ;;  %vm1784_vm5 = vcmp.eq.f32.partialorder %v1783_v34, 8.507059e+37 }
0x1302   :  { %v2420_v32 = vpop.eup %2419 }
0x1303   :  { %v1775_v29 = vmul.f32 %v2420_v32, %v1772_v45  ;;  %vm1780_vm0 = vweird.f32 %v2420_v32 }
0x1304   :  { %vm1781_vm2 = vmor %vm1779_vm1, %vm1780_vm0 }
0x1305   :  { %v1776_v37 = vsub.f32 1.0, %v1775_v29 }
0x1307   :  { %v1777_v27 = vmul.f32 %v2420_v32, %v1776_v37 }
0x1309   :  { %v1778_v54 = vadd.f32 %v2420_v32, %v1777_v27 }
0x130b   :  { %v1782_v33 = vsel %vm1781_vm2, %v2420_v32, %v1778_v54 }
0x130c   :  { %v1787_v43 = vsel %vm1784_vm5, %v1786_v38, %v1782_v33 }
0x130d   :  { %v1805_v52 = vmul.f32 %v1787_v43, %v2961_v42 }
0x136b   :  { %v1808_v12 = vpop.permute.xlu0 %1807 }
0x136c   :  { %v1810_v40 = vmul.f32 %v1808_v12, %v1787_v43 }
0x136e   :  { %1812 = vrot.lane.b32.xlu1 %v1810_v40, %s2461_s7 }
0x13e0   :  { %v1813_v8 = vpop.permute.xlu1 %1812 }
0x13e1   :  { %v1815_v23 = vadd.f32 %v1813_v8, %v1805_v52 }
0x13e3   :  { %2421 = vtanh.f32 %v1815_v23 }
0x13e4   :  { %2423 = vpow2.f32 %v2183_v18 }
0x13e9   :  { %v2422_v46 = vpop.eup %2421 }
0x13ea   :  { %1818 = vrot.lane.b32.xlu2 %v2422_v46, %s2461_s7  ;;  %v2424_v21 = vpop.eup %2423 }
0x13eb   :  { %v1773_v1 = vadd.f32 1.0, %v2424_v21 }
0x13ed   :  { %2425 = vrcp.f32 %v1773_v1  ;;  %v1800_v4 = vand.u32 2147483648, %v1773_v1  ;;  %vm1794_vm3 = vweird.f32 %v1773_v1  ;;  %v1798_v5 = vand.u32 2147483647, %v1773_v1 }
0x13ef   :  { %v1801_v9 = vor.u32 1.1754944e-38, %v1800_v4  ;;  %vm1799_vm4 = vcmp.eq.f32.partialorder %v1798_v5, 8.507059e+37 }
0x13f3   :  { %v2426_v42 = vpop.eup %2425 }
0x13f4   :  { %v1790_v19 = vmul.f32 %v2426_v42, %v1773_v1  ;;  %vm1795_vm9 = vweird.f32 %v2426_v42 }
0x13f5   :  { %vm1796_vm7 = vmor %vm1794_vm3, %vm1795_vm9 }
0x13f6   :  { %v1791_v63 = vsub.f32 1.0, %v1790_v19 }
0x13f8   :  { %v1792_v17 = vmul.f32 %v2426_v42, %v1791_v63 }
0x13fa   :  { %v1793_v2 = vadd.f32 %v2426_v42, %v1792_v17 }
0x13fc   :  { %v1797_v7 = vsel %vm1796_vm7, %v2426_v42, %v1793_v2 }
0x13fd   :  { %v1802_v13 = vsel %vm1799_vm4, %v1801_v9, %v1797_v7 }
0x1444   :  { %v1819_v25 = vpop.permute.xlu2 %1818 }
0x1445   :  { %v1821_v10 = vmul.f32 %v1819_v25, %v1802_v13 }
0x1447   :  { %v1822_v31 = vpack.c.bf16 %v1821_v10, %v1821_v10 }
0x1449   :  { %2217 = vmatmul.msk.bf16.vlgmr.msrb.gmra.mxu3 %vm456_vm6, %v1822_v31  ;;  %2218 = vmatmul.msk.bf16.vlgmr.msrb.gmra.mxu0 %vm456_vm6, %v1822_v31 }
0x14c6   :  { %v1903_v60 = vpop.f32.mrf.mxu0 }
0x14c7   :  { %v1904_v61 = vadd.f32 %v1903_v60, %v1835_v30 }
0x14c9   :  { %1908 = vst [vmem:[%s2991_s3 + $0x8] sm:$0xff] %v1904_v61 }
0x14cc   :  { %v1890_v15 = vpop.f32.mrf.mxu3 }
0x14cd   :  { %v1891_v28 = vadd.f32 %v1890_v15, %v1834_v0 }
0x14ce   :  { %v1905_v45 = vpop.f32.mrf.mxu0 }
0x14cf   :  { %1907 = vst [vmem:[%s2991_s3] sm:$0xff] %v1891_v28 }
0x14d4   :  { %v1892_v32 = vpop.f32.mrf.mxu3 }
0x14d5   :  { %1913 = vsyncpa [#allocation3], 1 }

</bundles_post_ra>
